<compile_context>
chip_gen: v6e
topology: v6e:2x2x1
jax: 0.10.0
libtpu: 0.0.40
codegen_flags: <defaults>
</compile_context>

<pallas_src>
import numpy as np
import jax
import jax.numpy as jnp
from jax.experimental import pallas as pl
from jax.experimental.pallas import tpu as pltpu


def _conv_out(s, k=3, st=2):
    return (s - (k - 1) - 1) // st + 1


# ----------------------------------------------------------------------------
# The fused Pallas kernel: whole forward pass, everything in VMEM.
# ----------------------------------------------------------------------------
def _dqn_kernel(p1_ref, w1_ref, g2_ref, w2_ref, g3_ref, w3_ref,
                wfc_ref, whd_ref, b_ref, o_ref):
    f32, bf16 = jnp.float32, jnp.bfloat16

    # Packed per-layer shifts / biases (one lane-padded f32 constant).
    b1 = b_ref[0:1, 0:16]
    b2 = b_ref[1:2, 0:32]
    b3 = b_ref[2:3, 0:32]
    bfc = b_ref[3:4, 0:32]
    bhd = b_ref[4:5, 0:12]

    # conv1 + BN1 + ReLU: prebuilt im2col patches @ BN-folded weight.
    a1 = jnp.dot(p1_ref[...].astype(bf16), w1_ref[...],
                 preferred_element_type=f32)
    a1 = jnp.maximum(a1 + b1, 0.0).astype(bf16)              # [R1, 16]

    # conv2 + BN2 + ReLU: 9 taps of (0/1 row-gather matmul) @ per-tap weight.
    acc2 = jnp.zeros((g2_ref.shape[1], w2_ref.shape[2]), f32)
    for t in range(9):
        rows = jnp.dot(g2_ref[t], a1, preferred_element_type=f32).astype(bf16)
        acc2 = acc2 + jnp.dot(rows, w2_ref[t], preferred_element_type=f32)
    a2 = jnp.maximum(acc2 + b2, 0.0).astype(bf16)            # [R2, 32]

    # conv3 + BN3 + ReLU.
    acc3 = jnp.zeros((g3_ref.shape[1], w3_ref.shape[2]), f32)
    for t in range(9):
        rows = jnp.dot(g3_ref[t], a2, preferred_element_type=f32).astype(bf16)
        acc3 = acc3 + jnp.dot(rows, w3_ref[t], preferred_element_type=f32)
    a3 = jnp.maximum(acc3 + b3, 0.0).astype(bf16)            # [R3, 32]

    # fullconnected + ReLU (flatten is identity: conv3 spatial is 1x1).
    h = jnp.dot(a3, wfc_ref[...], preferred_element_type=f32)
    h = jnp.maximum(h + bfc, 0.0).astype(bf16)               # [R3, 32]

    # head (no ReLU).
    o_ref[...] = jnp.dot(h, whd_ref[...], preferred_element_type=f32) + bhd


# ----------------------------------------------------------------------------
# Jitted glue: im2col of the raw NCHW input for conv1 only.
# ----------------------------------------------------------------------------
def _im2col_3x3_s2(x):
    """x: [N, C, H, W] -> patches [N*Ho*Wo, C*9] (cols ordered (c, kh, kw))."""
    N, C, H, W = x.shape
    k, s = 3, 2
    Ho, Wo = (H - k) // s + 1, (W - k) // s + 1
    taps = [x[:, :, i:i + s * Ho:s, j:j + s * Wo:s]
            for i in range(k) for j in range(k)]             # each [N,C,Ho,Wo]
    p = jnp.stack(taps, axis=2)                              # [N, C, 9, Ho, Wo]
    p = p.transpose(0, 3, 4, 1, 2)                           # [N, Ho, Wo, C, 9]
    return p.reshape(N * Ho * Wo, C * k * k)


def _gather_mats(n, hi, wi, ho, wo, dtype):
    """[9, n*ho*wo, n*hi*wi] 0/1 row-selection matrices, one per 3x3 tap."""
    g = np.zeros((9, n * ho * wo, n * hi * wi), np.float32)
    for kh in range(3):
        for kw in range(3):
            t = kh * 3 + kw
            for b in range(n):
                for y in range(ho):
                    for z in range(wo):
                        r_out = b * ho * wo + y * wo + z
                        r_in = b * hi * wi + (2 * y + kh) * wi + (2 * z + kw)
                        g[t, r_out, r_in] = 1.0
    return jnp.asarray(g, dtype)


# ----------------------------------------------------------------------------
# Deterministic parameter construction (shapes from DQN.__init__).
# ----------------------------------------------------------------------------
def init_params(h, w, key):
    convw = _conv_out(_conv_out(_conv_out(w)))
    convh = _conv_out(_conv_out(_conv_out(h)))
    lin_in = convw * convh * 32

    ks = jax.random.split(key, 10)

    def unif(k, shape, fan_in):
        bound = 1.0 / float(np.sqrt(fan_in))
        return jax.random.uniform(k, shape, jnp.float32, -bound, bound)

    p = {}
    p["w1"], p["b1"] = unif(ks[0], (16, 3, 3, 3), 3 * 9), unif(ks[1], (16,), 3 * 9)
    p["bn1"] = (jnp.ones(16), jnp.zeros(16), jnp.zeros(16), jnp.ones(16))
    p["w2"], p["b2"] = unif(ks[2], (32, 16, 3, 3), 16 * 9), unif(ks[3], (32,), 16 * 9)
    p["bn2"] = (jnp.ones(32), jnp.zeros(32), jnp.zeros(32), jnp.ones(32))
    p["w3"], p["b3"] = unif(ks[4], (32, 32, 3, 3), 32 * 9), unif(ks[5], (32,), 32 * 9)
    p["bn3"] = (jnp.ones(32), jnp.zeros(32), jnp.zeros(32), jnp.ones(32))
    p["fc_w"], p["fc_b"] = unif(ks[6], (32, lin_in), lin_in), unif(ks[7], (32,), lin_in)
    p["hd_w"], p["hd_b"] = unif(ks[8], (12, 32), 32), unif(ks[9], (12,), 32)
    return p


# ----------------------------------------------------------------------------
# One-time constant folding: BN fold, transposes, casts, gather matrices.
# ----------------------------------------------------------------------------
def build_constants(params, batch, h, w, eps=1e-5):
    ho1, wo1 = _conv_out(h), _conv_out(w)
    ho2, wo2 = _conv_out(ho1), _conv_out(wo1)
    ho3, wo3 = _conv_out(ho2), _conv_out(wo2)
    # TODO(synk): general conv3 spatial > 1x1 (CHW flatten permutation) is not
    # wired into the fused kernel; h = w = 16 yields a 1x1 conv3 output.
    assert ho3 * wo3 == 1, "fused kernel assumes conv3 output spatial == 1x1"

    def fold(bc, bn):
        gamma, beta, mean, var = bn
        scale = gamma / jnp.sqrt(var + eps)                  # [O]
        shift = (bc - mean) * scale + beta                   # [O]
        return scale, shift

    s1, sh1 = fold(params["b1"], params["bn1"])
    s2, sh2 = fold(params["b2"], params["bn2"])
    s3, sh3 = fold(params["b3"], params["bn3"])

    bf16 = jnp.bfloat16
    c = {}
    # conv1: [27, 16] = w1.reshape(O, C*9)^T * scale (cols ordered (c,kh,kw)).
    c["w1"] = (params["w1"].reshape(16, 27).T * s1).astype(bf16)
    # conv2/3: per-tap slabs [9, C_in, C_out] (tap = kh*3 + kw), BN-scaled.
    c["w2"] = (params["w2"].transpose(2, 3, 1, 0).reshape(9, 16, 32) * s2).astype(bf16)
    c["w3"] = (params["w3"].transpose(2, 3, 1, 0).reshape(9, 32, 32) * s3).astype(bf16)
    # 0/1 spatial-gather matrices (conv-as-matmul row selection).
    c["g2"] = _gather_mats(batch, ho1, wo1, ho2, wo2, bf16)
    c["g3"] = _gather_mats(batch, ho2, wo2, ho3, wo3, bf16)
    # fc / head (flatten == identity because conv3 spatial is 1x1).
    c["wfc"] = params["fc_w"].T.astype(bf16)                 # [32, 32]
    c["whd"] = params["hd_w"].T.astype(bf16)                 # [32, 12]
    # All per-layer shifts/biases packed into one lane-padded f32 constant.
    b = jnp.zeros((8, 32), jnp.float32)
    b = b.at[0, :16].set(sh1).at[1, :32].set(sh2).at[2, :32].set(sh3)
    b = b.at[3, :32].set(params["fc_b"]).at[4, :12].set(params["hd_b"])
    c["bias"] = b
    return c


# ----------------------------------------------------------------------------
# Full DQN forward: one pallas_call, jitted wrapper.
# ----------------------------------------------------------------------------
def _dqn_forward(consts, x):
    patches = _im2col_3x3_s2(x)                              # [N*H1*W1, 27] f32
    out_rows = consts["g3"].shape[1]                         # N * H3 * W3
    return pl.pallas_call(
        _dqn_kernel,
        out_shape=jax.ShapeDtypeStruct((out_rows, 12), jnp.float32),
        in_specs=[pl.BlockSpec(memory_space=pltpu.MemorySpace.VMEM)] * 9,
        out_specs=pl.BlockSpec(memory_space=pltpu.MemorySpace.VMEM),
    )(patches, consts["w1"], consts["g2"], consts["w2"],
      consts["g3"], consts["w3"], consts["wfc"], consts["whd"],
      consts["bias"])


dqn_forward = jax.jit(_dqn_forward)


if __name__ == "__main__":
    H = W = 16
    BATCH = 2

    key = jax.random.PRNGKey(0)
    k_params, k_x = jax.random.split(key)
    params = init_params(H, W, k_params)
    consts = build_constants(params, BATCH, H, W)            # hoisted, one-time
    x = jax.random.normal(k_x, (BATCH, 3, H, W), jnp.float32)

    out = dqn_forward(consts, x)
    out = jax.block_until_ready(out)

    assert out.shape == (BATCH, 12), out.shape
    assert out.dtype == jnp.float32
    print("KERNEL_OK")
</pallas_src>

<mosaic_0001>
module attributes {stable_mosaic.version = 11 : i64} {
  func.func @_dqn_kernel(%arg0: memref<98x27xf32, #tpu.memory_space<vmem>>, %arg1: memref<27x16xbf16, #tpu.memory_space<vmem>>, %arg2: memref<9x18x98xbf16, #tpu.memory_space<vmem>>, %arg3: memref<9x16x32xbf16, #tpu.memory_space<vmem>>, %arg4: memref<9x2x18xbf16, #tpu.memory_space<vmem>>, %arg5: memref<9x32x32xbf16, #tpu.memory_space<vmem>>, %arg6: memref<32x32xbf16, #tpu.memory_space<vmem>>, %arg7: memref<32x12xbf16, #tpu.memory_space<vmem>>, %arg8: memref<8x32xf32, #tpu.memory_space<vmem>>, %arg9: memref<2x12xf32, #tpu.memory_space<vmem>>) attributes {dimension_semantics = [], scalar_prefetch = 0 : i64, scratch_operands = 0 : i64, tpu.core_type = #tpu.core_type<tc>} {
    %c0 = arith.constant 0 : index
    %c0_0 = arith.constant 0 : index
    %0 = vector.load %arg8[%c0, %c0_0] : memref<8x32xf32, #tpu.memory_space<vmem>>, vector<1x16xf32>
    %c1 = arith.constant 1 : index
    %c0_1 = arith.constant 0 : index
    %1 = vector.load %arg8[%c1, %c0_1] : memref<8x32xf32, #tpu.memory_space<vmem>>, vector<1x32xf32>
    %c2 = arith.constant 2 : index
    %c0_2 = arith.constant 0 : index
    %2 = vector.load %arg8[%c2, %c0_2] : memref<8x32xf32, #tpu.memory_space<vmem>>, vector<1x32xf32>
    %c3 = arith.constant 3 : index
    %c0_3 = arith.constant 0 : index
    %3 = vector.load %arg8[%c3, %c0_3] : memref<8x32xf32, #tpu.memory_space<vmem>>, vector<1x32xf32>
    %c4 = arith.constant 4 : index
    %c0_4 = arith.constant 0 : index
    %4 = vector.load %arg8[%c4, %c0_4] : memref<8x32xf32, #tpu.memory_space<vmem>>, vector<1x12xf32>
    %c0_5 = arith.constant 0 : index
    %c0_6 = arith.constant 0 : index
    %5 = vector.load %arg0[%c0_5, %c0_6] : memref<98x27xf32, #tpu.memory_space<vmem>>, vector<98x27xf32>
    %6 = arith.truncf %5 : vector<98x27xf32> to vector<98x27xbf16>
    %c0_7 = arith.constant 0 : index
    %c0_8 = arith.constant 0 : index
    %7 = vector.load %arg1[%c0_7, %c0_8] : memref<27x16xbf16, #tpu.memory_space<vmem>>, vector<27x16xbf16>
    %cst = arith.constant dense<0.000000e+00> : vector<98x16xf32>
    %8 = tpu.matmul %6, %7, %cst {dimension_numbers = #tpu.dot_dimension_numbers<[1], [0], [0], [1], [0, 0, 1, 1], [], []>} : vector<98x27xbf16>, vector<27x16xbf16>, vector<98x16xf32> -> vector<98x16xf32>
    %9 = vector.broadcast %0 : vector<1x16xf32> to vector<98x16xf32>
    %10 = arith.addf %8, %9 : vector<98x16xf32>
    %cst_9 = arith.constant 0.000000e+00 : f32
    %11 = vector.broadcast %cst_9 : f32 to vector<98x16xf32>
    %12 = arith.maximumf %10, %11 : vector<98x16xf32>
    %13 = arith.truncf %12 : vector<98x16xf32> to vector<98x16xbf16>
    %cst_10 = arith.constant 0.000000e+00 : f32
    %14 = vector.broadcast %cst_10 : f32 to vector<18x32xf32>
    %c0_11 = arith.constant 0 : index
    %c0_12 = arith.constant 0 : index
    %c0_13 = arith.constant 0 : index
    %15 = vector.load %arg2[%c0_11, %c0_12, %c0_13] : memref<9x18x98xbf16, #tpu.memory_space<vmem>>, vector<1x18x98xbf16>
    %16 = vector.shape_cast %15 : vector<1x18x98xbf16> to vector<18x98xbf16>
    %cst_14 = arith.constant dense<0.000000e+00> : vector<18x16xf32>
    %17 = tpu.matmul %16, %13, %cst_14 {dimension_numbers = #tpu.dot_dimension_numbers<[1], [0], [0], [1], [0, 0, 1, 1], [], []>} : vector<18x98xbf16>, vector<98x16xbf16>, vector<18x16xf32> -> vector<18x16xf32>
    %18 = arith.truncf %17 : vector<18x16xf32> to vector<18x16xbf16>
    %c0_15 = arith.constant 0 : index
    %c0_16 = arith.constant 0 : index
    %c0_17 = arith.constant 0 : index
    %19 = vector.load %arg3[%c0_15, %c0_16, %c0_17] : memref<9x16x32xbf16, #tpu.memory_space<vmem>>, vector<1x16x32xbf16>
    %20 = vector.shape_cast %19 : vector<1x16x32xbf16> to vector<16x32xbf16>
    %cst_18 = arith.constant dense<0.000000e+00> : vector<18x32xf32>
    %21 = tpu.matmul %18, %20, %cst_18 {dimension_numbers = #tpu.dot_dimension_numbers<[1], [0], [0], [1], [0, 0, 1, 1], [], []>} : vector<18x16xbf16>, vector<16x32xbf16>, vector<18x32xf32> -> vector<18x32xf32>
    %22 = arith.addf %14, %21 : vector<18x32xf32>
    %c1_19 = arith.constant 1 : index
    %c0_20 = arith.constant 0 : index
    %c0_21 = arith.constant 0 : index
    %23 = vector.load %arg2[%c1_19, %c0_20, %c0_21] : memref<9x18x98xbf16, #tpu.memory_space<vmem>>, vector<1x18x98xbf16>
    %24 = vector.shape_cast %23 : vector<1x18x98xbf16> to vector<18x98xbf16>
    %cst_22 = arith.constant dense<0.000000e+00> : vector<18x16xf32>
    %25 = tpu.matmul %24, %13, %cst_22 {dimension_numbers = #tpu.dot_dimension_numbers<[1], [0], [0], [1], [0, 0, 1, 1], [], []>} : vector<18x98xbf16>, vector<98x16xbf16>, vector<18x16xf32> -> vector<18x16xf32>
    %26 = arith.truncf %25 : vector<18x16xf32> to vector<18x16xbf16>
    %c1_23 = arith.constant 1 : index
    %c0_24 = arith.constant 0 : index
    %c0_25 = arith.constant 0 : index
    %27 = vector.load %arg3[%c1_23, %c0_24, %c0_25] : memref<9x16x32xbf16, #tpu.memory_space<vmem>>, vector<1x16x32xbf16>
    %28 = vector.shape_cast %27 : vector<1x16x32xbf16> to vector<16x32xbf16>
    %cst_26 = arith.constant dense<0.000000e+00> : vector<18x32xf32>
    %29 = tpu.matmul %26, %28, %cst_26 {dimension_numbers = #tpu.dot_dimension_numbers<[1], [0], [0], [1], [0, 0, 1, 1], [], []>} : vector<18x16xbf16>, vector<16x32xbf16>, vector<18x32xf32> -> vector<18x32xf32>
    %30 = arith.addf %22, %29 : vector<18x32xf32>
    %c2_27 = arith.constant 2 : index
    %c0_28 = arith.constant 0 : index
    %c0_29 = arith.constant 0 : index
    %31 = vector.load %arg2[%c2_27, %c0_28, %c0_29] : memref<9x18x98xbf16, #tpu.memory_space<vmem>>, vector<1x18x98xbf16>
    %32 = vector.shape_cast %31 : vector<1x18x98xbf16> to vector<18x98xbf16>
    %cst_30 = arith.constant dense<0.000000e+00> : vector<18x16xf32>
    %33 = tpu.matmul %32, %13, %cst_30 {dimension_numbers = #tpu.dot_dimension_numbers<[1], [0], [0], [1], [0, 0, 1, 1], [], []>} : vector<18x98xbf16>, vector<98x16xbf16>, vector<18x16xf32> -> vector<18x16xf32>
    %34 = arith.truncf %33 : vector<18x16xf32> to vector<18x16xbf16>
    %c2_31 = arith.constant 2 : index
    %c0_32 = arith.constant 0 : index
    %c0_33 = arith.constant 0 : index
    %35 = vector.load %arg3[%c2_31, %c0_32, %c0_33] : memref<9x16x32xbf16, #tpu.memory_space<vmem>>, vector<1x16x32xbf16>
    %36 = vector.shape_cast %35 : vector<1x16x32xbf16> to vector<16x32xbf16>
    %cst_34 = arith.constant dense<0.000000e+00> : vector<18x32xf32>
    %37 = tpu.matmul %34, %36, %cst_34 {dimension_numbers = #tpu.dot_dimension_numbers<[1], [0], [0], [1], [0, 0, 1, 1], [], []>} : vector<18x16xbf16>, vector<16x32xbf16>, vector<18x32xf32> -> vector<18x32xf32>
    %38 = arith.addf %30, %37 : vector<18x32xf32>
    %c3_35 = arith.constant 3 : index
    %c0_36 = arith.constant 0 : index
    %c0_37 = arith.constant 0 : index
    %39 = vector.load %arg2[%c3_35, %c0_36, %c0_37] : memref<9x18x98xbf16, #tpu.memory_space<vmem>>, vector<1x18x98xbf16>
    %40 = vector.shape_cast %39 : vector<1x18x98xbf16> to vector<18x98xbf16>
    %cst_38 = arith.constant dense<0.000000e+00> : vector<18x16xf32>
    %41 = tpu.matmul %40, %13, %cst_38 {dimension_numbers = #tpu.dot_dimension_numbers<[1], [0], [0], [1], [0, 0, 1, 1], [], []>} : vector<18x98xbf16>, vector<98x16xbf16>, vector<18x16xf32> -> vector<18x16xf32>
    %42 = arith.truncf %41 : vector<18x16xf32> to vector<18x16xbf16>
    %c3_39 = arith.constant 3 : index
    %c0_40 = arith.constant 0 : index
    %c0_41 = arith.constant 0 : index
    %43 = vector.load %arg3[%c3_39, %c0_40, %c0_41] : memref<9x16x32xbf16, #tpu.memory_space<vmem>>, vector<1x16x32xbf16>
    %44 = vector.shape_cast %43 : vector<1x16x32xbf16> to vector<16x32xbf16>
    %cst_42 = arith.constant dense<0.000000e+00> : vector<18x32xf32>
    %45 = tpu.matmul %42, %44, %cst_42 {dimension_numbers = #tpu.dot_dimension_numbers<[1], [0], [0], [1], [0, 0, 1, 1], [], []>} : vector<18x16xbf16>, vector<16x32xbf16>, vector<18x32xf32> -> vector<18x32xf32>
    %46 = arith.addf %38, %45 : vector<18x32xf32>
    %c4_43 = arith.constant 4 : index
    %c0_44 = arith.constant 0 : index
    %c0_45 = arith.constant 0 : index
    %47 = vector.load %arg2[%c4_43, %c0_44, %c0_45] : memref<9x18x98xbf16, #tpu.memory_space<vmem>>, vector<1x18x98xbf16>
    %48 = vector.shape_cast %47 : vector<1x18x98xbf16> to vector<18x98xbf16>
    %cst_46 = arith.constant dense<0.000000e+00> : vector<18x16xf32>
    %49 = tpu.matmul %48, %13, %cst_46 {dimension_numbers = #tpu.dot_dimension_numbers<[1], [0], [0], [1], [0, 0, 1, 1], [], []>} : vector<18x98xbf16>, vector<98x16xbf16>, vector<18x16xf32> -> vector<18x16xf32>
    %50 = arith.truncf %49 : vector<18x16xf32> to vector<18x16xbf16>
    %c4_47 = arith.constant 4 : index
    %c0_48 = arith.constant 0 : index
    %c0_49 = arith.constant 0 : index
    %51 = vector.load %arg3[%c4_47, %c0_48, %c0_49] : memref<9x16x32xbf16, #tpu.memory_space<vmem>>, vector<1x16x32xbf16>
    %52 = vector.shape_cast %51 : vector<1x16x32xbf16> to vector<16x32xbf16>
    %cst_50 = arith.constant dense<0.000000e+00> : vector<18x32xf32>
    %53 = tpu.matmul %50, %52, %cst_50 {dimension_numbers = #tpu.dot_dimension_numbers<[1], [0], [0], [1], [0, 0, 1, 1], [], []>} : vector<18x16xbf16>, vector<16x32xbf16>, vector<18x32xf32> -> vector<18x32xf32>
    %54 = arith.addf %46, %53 : vector<18x32xf32>
    %c5 = arith.constant 5 : index
    %c0_51 = arith.constant 0 : index
    %c0_52 = arith.constant 0 : index
    %55 = vector.load %arg2[%c5, %c0_51, %c0_52] : memref<9x18x98xbf16, #tpu.memory_space<vmem>>, vector<1x18x98xbf16>
    %56 = vector.shape_cast %55 : vector<1x18x98xbf16> to vector<18x98xbf16>
    %cst_53 = arith.constant dense<0.000000e+00> : vector<18x16xf32>
    %57 = tpu.matmul %56, %13, %cst_53 {dimension_numbers = #tpu.dot_dimension_numbers<[1], [0], [0], [1], [0, 0, 1, 1], [], []>} : vector<18x98xbf16>, vector<98x16xbf16>, vector<18x16xf32> -> vector<18x16xf32>
    %58 = arith.truncf %57 : vector<18x16xf32> to vector<18x16xbf16>
    %c5_54 = arith.constant 5 : index
    %c0_55 = arith.constant 0 : index
    %c0_56 = arith.constant 0 : index
    %59 = vector.load %arg3[%c5_54, %c0_55, %c0_56] : memref<9x16x32xbf16, #tpu.memory_space<vmem>>, vector<1x16x32xbf16>
    %60 = vector.shape_cast %59 : vector<1x16x32xbf16> to vector<16x32xbf16>
    %cst_57 = arith.constant dense<0.000000e+00> : vector<18x32xf32>
    %61 = tpu.matmul %58, %60, %cst_57 {dimension_numbers = #tpu.dot_dimension_numbers<[1], [0], [0], [1], [0, 0, 1, 1], [], []>} : vector<18x16xbf16>, vector<16x32xbf16>, vector<18x32xf32> -> vector<18x32xf32>
    %62 = arith.addf %54, %61 : vector<18x32xf32>
    %c6 = arith.constant 6 : index
    %c0_58 = arith.constant 0 : index
    %c0_59 = arith.constant 0 : index
    %63 = vector.load %arg2[%c6, %c0_58, %c0_59] : memref<9x18x98xbf16, #tpu.memory_space<vmem>>, vector<1x18x98xbf16>
    %64 = vector.shape_cast %63 : vector<1x18x98xbf16> to vector<18x98xbf16>
    %cst_60 = arith.constant dense<0.000000e+00> : vector<18x16xf32>
    %65 = tpu.matmul %64, %13, %cst_60 {dimension_numbers = #tpu.dot_dimension_numbers<[1], [0], [0], [1], [0, 0, 1, 1], [], []>} : vector<18x98xbf16>, vector<98x16xbf16>, vector<18x16xf32> -> vector<18x16xf32>
    %66 = arith.truncf %65 : vector<18x16xf32> to vector<18x16xbf16>
    %c6_61 = arith.constant 6 : index
    %c0_62 = arith.constant 0 : index
    %c0_63 = arith.constant 0 : index
    %67 = vector.load %arg3[%c6_61, %c0_62, %c0_63] : memref<9x16x32xbf16, #tpu.memory_space<vmem>>, vector<1x16x32xbf16>
    %68 = vector.shape_cast %67 : vector<1x16x32xbf16> to vector<16x32xbf16>
    %cst_64 = arith.constant dense<0.000000e+00> : vector<18x32xf32>
    %69 = tpu.matmul %66, %68, %cst_64 {dimension_numbers = #tpu.dot_dimension_numbers<[1], [0], [0], [1], [0, 0, 1, 1], [], []>} : vector<18x16xbf16>, vector<16x32xbf16>, vector<18x32xf32> -> vector<18x32xf32>
    %70 = arith.addf %62, %69 : vector<18x32xf32>
    %c7 = arith.constant 7 : index
    %c0_65 = arith.constant 0 : index
    %c0_66 = arith.constant 0 : index
    %71 = vector.load %arg2[%c7, %c0_65, %c0_66] : memref<9x18x98xbf16, #tpu.memory_space<vmem>>, vector<1x18x98xbf16>
    %72 = vector.shape_cast %71 : vector<1x18x98xbf16> to vector<18x98xbf16>
    %cst_67 = arith.constant dense<0.000000e+00> : vector<18x16xf32>
    %73 = tpu.matmul %72, %13, %cst_67 {dimension_numbers = #tpu.dot_dimension_numbers<[1], [0], [0], [1], [0, 0, 1, 1], [], []>} : vector<18x98xbf16>, vector<98x16xbf16>, vector<18x16xf32> -> vector<18x16xf32>
    %74 = arith.truncf %73 : vector<18x16xf32> to vector<18x16xbf16>
    %c7_68 = arith.constant 7 : index
    %c0_69 = arith.constant 0 : index
    %c0_70 = arith.constant 0 : index
    %75 = vector.load %arg3[%c7_68, %c0_69, %c0_70] : memref<9x16x32xbf16, #tpu.memory_space<vmem>>, vector<1x16x32xbf16>
    %76 = vector.shape_cast %75 : vector<1x16x32xbf16> to vector<16x32xbf16>
    %cst_71 = arith.constant dense<0.000000e+00> : vector<18x32xf32>
    %77 = tpu.matmul %74, %76, %cst_71 {dimension_numbers = #tpu.dot_dimension_numbers<[1], [0], [0], [1], [0, 0, 1, 1], [], []>} : vector<18x16xbf16>, vector<16x32xbf16>, vector<18x32xf32> -> vector<18x32xf32>
    %78 = arith.addf %70, %77 : vector<18x32xf32>
    %c8 = arith.constant 8 : index
    %c0_72 = arith.constant 0 : index
    %c0_73 = arith.constant 0 : index
    %79 = vector.load %arg2[%c8, %c0_72, %c0_73] : memref<9x18x98xbf16, #tpu.memory_space<vmem>>, vector<1x18x98xbf16>
    %80 = vector.shape_cast %79 : vector<1x18x98xbf16> to vector<18x98xbf16>
    %cst_74 = arith.constant dense<0.000000e+00> : vector<18x16xf32>
    %81 = tpu.matmul %80, %13, %cst_74 {dimension_numbers = #tpu.dot_dimension_numbers<[1], [0], [0], [1], [0, 0, 1, 1], [], []>} : vector<18x98xbf16>, vector<98x16xbf16>, vector<18x16xf32> -> vector<18x16xf32>
    %82 = arith.truncf %81 : vector<18x16xf32> to vector<18x16xbf16>
    %c8_75 = arith.constant 8 : index
    %c0_76 = arith.constant 0 : index
    %c0_77 = arith.constant 0 : index
    %83 = vector.load %arg3[%c8_75, %c0_76, %c0_77] : memref<9x16x32xbf16, #tpu.memory_space<vmem>>, vector<1x16x32xbf16>
    %84 = vector.shape_cast %83 : vector<1x16x32xbf16> to vector<16x32xbf16>
    %cst_78 = arith.constant dense<0.000000e+00> : vector<18x32xf32>
    %85 = tpu.matmul %82, %84, %cst_78 {dimension_numbers = #tpu.dot_dimension_numbers<[1], [0], [0], [1], [0, 0, 1, 1], [], []>} : vector<18x16xbf16>, vector<16x32xbf16>, vector<18x32xf32> -> vector<18x32xf32>
    %86 = arith.addf %78, %85 : vector<18x32xf32>
    %87 = vector.broadcast %1 : vector<1x32xf32> to vector<18x32xf32>
    %88 = arith.addf %86, %87 : vector<18x32xf32>
    %cst_79 = arith.constant 0.000000e+00 : f32
    %89 = vector.broadcast %cst_79 : f32 to vector<18x32xf32>
    %90 = arith.maximumf %88, %89 : vector<18x32xf32>
    %91 = arith.truncf %90 : vector<18x32xf32> to vector<18x32xbf16>
    %cst_80 = arith.constant 0.000000e+00 : f32
    %92 = vector.broadcast %cst_80 : f32 to vector<2x32xf32>
    %c0_81 = arith.constant 0 : index
    %c0_82 = arith.constant 0 : index
    %c0_83 = arith.constant 0 : index
    %93 = vector.load %arg4[%c0_81, %c0_82, %c0_83] : memref<9x2x18xbf16, #tpu.memory_space<vmem>>, vector<1x2x18xbf16>
    %94 = vector.shape_cast %93 : vector<1x2x18xbf16> to vector<2x18xbf16>
    %cst_84 = arith.constant dense<0.000000e+00> : vector<2x32xf32>
    %95 = tpu.matmul %94, %91, %cst_84 {dimension_numbers = #tpu.dot_dimension_numbers<[1], [0], [0], [1], [0, 0, 1, 1], [], []>} : vector<2x18xbf16>, vector<18x32xbf16>, vector<2x32xf32> -> vector<2x32xf32>
    %96 = arith.truncf %95 : vector<2x32xf32> to vector<2x32xbf16>
    %c0_85 = arith.constant 0 : index
    %c0_86 = arith.constant 0 : index
    %c0_87 = arith.constant 0 : index
    %97 = vector.load %arg5[%c0_85, %c0_86, %c0_87] : memref<9x32x32xbf16, #tpu.memory_space<vmem>>, vector<1x32x32xbf16>
    %98 = vector.shape_cast %97 : vector<1x32x32xbf16> to vector<32x32xbf16>
    %cst_88 = arith.constant dense<0.000000e+00> : vector<2x32xf32>
    %99 = tpu.matmul %96, %98, %cst_88 {dimension_numbers = #tpu.dot_dimension_numbers<[1], [0], [0], [1], [0, 0, 1, 1], [], []>} : vector<2x32xbf16>, vector<32x32xbf16>, vector<2x32xf32> -> vector<2x32xf32>
    %100 = arith.addf %92, %99 : vector<2x32xf32>
    %c1_89 = arith.constant 1 : index
    %c0_90 = arith.constant 0 : index
    %c0_91 = arith.constant 0 : index
    %101 = vector.load %arg4[%c1_89, %c0_90, %c0_91] : memref<9x2x18xbf16, #tpu.memory_space<vmem>>, vector<1x2x18xbf16>
    %102 = vector.shape_cast %101 : vector<1x2x18xbf16> to vector<2x18xbf16>
    %cst_92 = arith.constant dense<0.000000e+00> : vector<2x32xf32>
    %103 = tpu.matmul %102, %91, %cst_92 {dimension_numbers = #tpu.dot_dimension_numbers<[1], [0], [0], [1], [0, 0, 1, 1], [], []>} : vector<2x18xbf16>, vector<18x32xbf16>, vector<2x32xf32> -> vector<2x32xf32>
    %104 = arith.truncf %103 : vector<2x32xf32> to vector<2x32xbf16>
    %c1_93 = arith.constant 1 : index
    %c0_94 = arith.constant 0 : index
    %c0_95 = arith.constant 0 : index
    %105 = vector.load %arg5[%c1_93, %c0_94, %c0_95] : memref<9x32x32xbf16, #tpu.memory_space<vmem>>, vector<1x32x32xbf16>
    %106 = vector.shape_cast %105 : vector<1x32x32xbf16> to vector<32x32xbf16>
    %cst_96 = arith.constant dense<0.000000e+00> : vector<2x32xf32>
    %107 = tpu.matmul %104, %106, %cst_96 {dimension_numbers = #tpu.dot_dimension_numbers<[1], [0], [0], [1], [0, 0, 1, 1], [], []>} : vector<2x32xbf16>, vector<32x32xbf16>, vector<2x32xf32> -> vector<2x32xf32>
    %108 = arith.addf %100, %107 : vector<2x32xf32>
    %c2_97 = arith.constant 2 : index
    %c0_98 = arith.constant 0 : index
    %c0_99 = arith.constant 0 : index
    %109 = vector.load %arg4[%c2_97, %c0_98, %c0_99] : memref<9x2x18xbf16, #tpu.memory_space<vmem>>, vector<1x2x18xbf16>
    %110 = vector.shape_cast %109 : vector<1x2x18xbf16> to vector<2x18xbf16>
    %cst_100 = arith.constant dense<0.000000e+00> : vector<2x32xf32>
    %111 = tpu.matmul %110, %91, %cst_100 {dimension_numbers = #tpu.dot_dimension_numbers<[1], [0], [0], [1], [0, 0, 1, 1], [], []>} : vector<2x18xbf16>, vector<18x32xbf16>, vector<2x32xf32> -> vector<2x32xf32>
    %112 = arith.truncf %111 : vector<2x32xf32> to vector<2x32xbf16>
    %c2_101 = arith.constant 2 : index
    %c0_102 = arith.constant 0 : index
    %c0_103 = arith.constant 0 : index
    %113 = vector.load %arg5[%c2_101, %c0_102, %c0_103] : memref<9x32x32xbf16, #tpu.memory_space<vmem>>, vector<1x32x32xbf16>
    %114 = vector.shape_cast %113 : vector<1x32x32xbf16> to vector<32x32xbf16>
    %cst_104 = arith.constant dense<0.000000e+00> : vector<2x32xf32>
    %115 = tpu.matmul %112, %114, %cst_104 {dimension_numbers = #tpu.dot_dimension_numbers<[1], [0], [0], [1], [0, 0, 1, 1], [], []>} : vector<2x32xbf16>, vector<32x32xbf16>, vector<2x32xf32> -> vector<2x32xf32>
    %116 = arith.addf %108, %115 : vector<2x32xf32>
    %c3_105 = arith.constant 3 : index
    %c0_106 = arith.constant 0 : index
    %c0_107 = arith.constant 0 : index
    %117 = vector.load %arg4[%c3_105, %c0_106, %c0_107] : memref<9x2x18xbf16, #tpu.memory_space<vmem>>, vector<1x2x18xbf16>
    %118 = vector.shape_cast %117 : vector<1x2x18xbf16> to vector<2x18xbf16>
    %cst_108 = arith.constant dense<0.000000e+00> : vector<2x32xf32>
    %119 = tpu.matmul %118, %91, %cst_108 {dimension_numbers = #tpu.dot_dimension_numbers<[1], [0], [0], [1], [0, 0, 1, 1], [], []>} : vector<2x18xbf16>, vector<18x32xbf16>, vector<2x32xf32> -> vector<2x32xf32>
    %120 = arith.truncf %119 : vector<2x32xf32> to vector<2x32xbf16>
    %c3_109 = arith.constant 3 : index
    %c0_110 = arith.constant 0 : index
    %c0_111 = arith.constant 0 : index
    %121 = vector.load %arg5[%c3_109, %c0_110, %c0_111] : memref<9x32x32xbf16, #tpu.memory_space<vmem>>, vector<1x32x32xbf16>
    %122 = vector.shape_cast %121 : vector<1x32x32xbf16> to vector<32x32xbf16>
    %cst_112 = arith.constant dense<0.000000e+00> : vector<2x32xf32>
    %123 = tpu.matmul %120, %122, %cst_112 {dimension_numbers = #tpu.dot_dimension_numbers<[1], [0], [0], [1], [0, 0, 1, 1], [], []>} : vector<2x32xbf16>, vector<32x32xbf16>, vector<2x32xf32> -> vector<2x32xf32>
    %124 = arith.addf %116, %123 : vector<2x32xf32>
    %c4_113 = arith.constant 4 : index
    %c0_114 = arith.constant 0 : index
    %c0_115 = arith.constant 0 : index
    %125 = vector.load %arg4[%c4_113, %c0_114, %c0_115] : memref<9x2x18xbf16, #tpu.memory_space<vmem>>, vector<1x2x18xbf16>
    %126 = vector.shape_cast %125 : vector<1x2x18xbf16> to vector<2x18xbf16>
    %cst_116 = arith.constant dense<0.000000e+00> : vector<2x32xf32>
    %127 = tpu.matmul %126, %91, %cst_116 {dimension_numbers = #tpu.dot_dimension_numbers<[1], [0], [0], [1], [0, 0, 1, 1], [], []>} : vector<2x18xbf16>, vector<18x32xbf16>, vector<2x32xf32> -> vector<2x32xf32>
    %128 = arith.truncf %127 : vector<2x32xf32> to vector<2x32xbf16>
    %c4_117 = arith.constant 4 : index
    %c0_118 = arith.constant 0 : index
    %c0_119 = arith.constant 0 : index
    %129 = vector.load %arg5[%c4_117, %c0_118, %c0_119] : memref<9x32x32xbf16, #tpu.memory_space<vmem>>, vector<1x32x32xbf16>
    %130 = vector.shape_cast %129 : vector<1x32x32xbf16> to vector<32x32xbf16>
    %cst_120 = arith.constant dense<0.000000e+00> : vector<2x32xf32>
    %131 = tpu.matmul %128, %130, %cst_120 {dimension_numbers = #tpu.dot_dimension_numbers<[1], [0], [0], [1], [0, 0, 1, 1], [], []>} : vector<2x32xbf16>, vector<32x32xbf16>, vector<2x32xf32> -> vector<2x32xf32>
    %132 = arith.addf %124, %131 : vector<2x32xf32>
    %c5_121 = arith.constant 5 : index
    %c0_122 = arith.constant 0 : index
    %c0_123 = arith.constant 0 : index
    %133 = vector.load %arg4[%c5_121, %c0_122, %c0_123] : memref<9x2x18xbf16, #tpu.memory_space<vmem>>, vector<1x2x18xbf16>
    %134 = vector.shape_cast %133 : vector<1x2x18xbf16> to vector<2x18xbf16>
    %cst_124 = arith.constant dense<0.000000e+00> : vector<2x32xf32>
    %135 = tpu.matmul %134, %91, %cst_124 {dimension_numbers = #tpu.dot_dimension_numbers<[1], [0], [0], [1], [0, 0, 1, 1], [], []>} : vector<2x18xbf16>, vector<18x32xbf16>, vector<2x32xf32> -> vector<2x32xf32>
    %136 = arith.truncf %135 : vector<2x32xf32> to vector<2x32xbf16>
    %c5_125 = arith.constant 5 : index
    %c0_126 = arith.constant 0 : index
    %c0_127 = arith.constant 0 : index
    %137 = vector.load %arg5[%c5_125, %c0_126, %c0_127] : memref<9x32x32xbf16, #tpu.memory_space<vmem>>, vector<1x32x32xbf16>
    %138 = vector.shape_cast %137 : vector<1x32x32xbf16> to vector<32x32xbf16>
    %cst_128 = arith.constant dense<0.000000e+00> : vector<2x32xf32>
    %139 = tpu.matmul %136, %138, %cst_128 {dimension_numbers = #tpu.dot_dimension_numbers<[1], [0], [0], [1], [0, 0, 1, 1], [], []>} : vector<2x32xbf16>, vector<32x32xbf16>, vector<2x32xf32> -> vector<2x32xf32>
    %140 = arith.addf %132, %139 : vector<2x32xf32>
    %c6_129 = arith.constant 6 : index
    %c0_130 = arith.constant 0 : index
    %c0_131 = arith.constant 0 : index
    %141 = vector.load %arg4[%c6_129, %c0_130, %c0_131] : memref<9x2x18xbf16, #tpu.memory_space<vmem>>, vector<1x2x18xbf16>
    %142 = vector.shape_cast %141 : vector<1x2x18xbf16> to vector<2x18xbf16>
    %cst_132 = arith.constant dense<0.000000e+00> : vector<2x32xf32>
    %143 = tpu.matmul %142, %91, %cst_132 {dimension_numbers = #tpu.dot_dimension_numbers<[1], [0], [0], [1], [0, 0, 1, 1], [], []>} : vector<2x18xbf16>, vector<18x32xbf16>, vector<2x32xf32> -> vector<2x32xf32>
    %144 = arith.truncf %143 : vector<2x32xf32> to vector<2x32xbf16>
    %c6_133 = arith.constant 6 : index
    %c0_134 = arith.constant 0 : index
    %c0_135 = arith.constant 0 : index
    %145 = vector.load %arg5[%c6_133, %c0_134, %c0_135] : memref<9x32x32xbf16, #tpu.memory_space<vmem>>, vector<1x32x32xbf16>
    %146 = vector.shape_cast %145 : vector<1x32x32xbf16> to vector<32x32xbf16>
    %cst_136 = arith.constant dense<0.000000e+00> : vector<2x32xf32>
    %147 = tpu.matmul %144, %146, %cst_136 {dimension_numbers = #tpu.dot_dimension_numbers<[1], [0], [0], [1], [0, 0, 1, 1], [], []>} : vector<2x32xbf16>, vector<32x32xbf16>, vector<2x32xf32> -> vector<2x32xf32>
    %148 = arith.addf %140, %147 : vector<2x32xf32>
    %c7_137 = arith.constant 7 : index
    %c0_138 = arith.constant 0 : index
    %c0_139 = arith.constant 0 : index
    %149 = vector.load %arg4[%c7_137, %c0_138, %c0_139] : memref<9x2x18xbf16, #tpu.memory_space<vmem>>, vector<1x2x18xbf16>
    %150 = vector.shape_cast %149 : vector<1x2x18xbf16> to vector<2x18xbf16>
    %cst_140 = arith.constant dense<0.000000e+00> : vector<2x32xf32>
    %151 = tpu.matmul %150, %91, %cst_140 {dimension_numbers = #tpu.dot_dimension_numbers<[1], [0], [0], [1], [0, 0, 1, 1], [], []>} : vector<2x18xbf16>, vector<18x32xbf16>, vector<2x32xf32> -> vector<2x32xf32>
    %152 = arith.truncf %151 : vector<2x32xf32> to vector<2x32xbf16>
    %c7_141 = arith.constant 7 : index
    %c0_142 = arith.constant 0 : index
    %c0_143 = arith.constant 0 : index
    %153 = vector.load %arg5[%c7_141, %c0_142, %c0_143] : memref<9x32x32xbf16, #tpu.memory_space<vmem>>, vector<1x32x32xbf16>
    %154 = vector.shape_cast %153 : vector<1x32x32xbf16> to vector<32x32xbf16>
    %cst_144 = arith.constant dense<0.000000e+00> : vector<2x32xf32>
    %155 = tpu.matmul %152, %154, %cst_144 {dimension_numbers = #tpu.dot_dimension_numbers<[1], [0], [0], [1], [0, 0, 1, 1], [], []>} : vector<2x32xbf16>, vector<32x32xbf16>, vector<2x32xf32> -> vector<2x32xf32>
    %156 = arith.addf %148, %155 : vector<2x32xf32>
    %c8_145 = arith.constant 8 : index
    %c0_146 = arith.constant 0 : index
    %c0_147 = arith.constant 0 : index
    %157 = vector.load %arg4[%c8_145, %c0_146, %c0_147] : memref<9x2x18xbf16, #tpu.memory_space<vmem>>, vector<1x2x18xbf16>
    %158 = vector.shape_cast %157 : vector<1x2x18xbf16> to vector<2x18xbf16>
    %cst_148 = arith.constant dense<0.000000e+00> : vector<2x32xf32>
    %159 = tpu.matmul %158, %91, %cst_148 {dimension_numbers = #tpu.dot_dimension_numbers<[1], [0], [0], [1], [0, 0, 1, 1], [], []>} : vector<2x18xbf16>, vector<18x32xbf16>, vector<2x32xf32> -> vector<2x32xf32>
    %160 = arith.truncf %159 : vector<2x32xf32> to vector<2x32xbf16>
    %c8_149 = arith.constant 8 : index
    %c0_150 = arith.constant 0 : index
    %c0_151 = arith.constant 0 : index
    %161 = vector.load %arg5[%c8_149, %c0_150, %c0_151] : memref<9x32x32xbf16, #tpu.memory_space<vmem>>, vector<1x32x32xbf16>
    %162 = vector.shape_cast %161 : vector<1x32x32xbf16> to vector<32x32xbf16>
    %cst_152 = arith.constant dense<0.000000e+00> : vector<2x32xf32>
    %163 = tpu.matmul %160, %162, %cst_152 {dimension_numbers = #tpu.dot_dimension_numbers<[1], [0], [0], [1], [0, 0, 1, 1], [], []>} : vector<2x32xbf16>, vector<32x32xbf16>, vector<2x32xf32> -> vector<2x32xf32>
    %164 = arith.addf %156, %163 : vector<2x32xf32>
    %165 = vector.broadcast %2 : vector<1x32xf32> to vector<2x32xf32>
    %166 = arith.addf %164, %165 : vector<2x32xf32>
    %cst_153 = arith.constant 0.000000e+00 : f32
    %167 = vector.broadcast %cst_153 : f32 to vector<2x32xf32>
    %168 = arith.maximumf %166, %167 : vector<2x32xf32>
    %169 = arith.truncf %168 : vector<2x32xf32> to vector<2x32xbf16>
    %c0_154 = arith.constant 0 : index
    %c0_155 = arith.constant 0 : index
    %170 = vector.load %arg6[%c0_154, %c0_155] : memref<32x32xbf16, #tpu.memory_space<vmem>>, vector<32x32xbf16>
    %cst_156 = arith.constant dense<0.000000e+00> : vector<2x32xf32>
    %171 = tpu.matmul %169, %170, %cst_156 {dimension_numbers = #tpu.dot_dimension_numbers<[1], [0], [0], [1], [0, 0, 1, 1], [], []>} : vector<2x32xbf16>, vector<32x32xbf16>, vector<2x32xf32> -> vector<2x32xf32>
    %172 = vector.broadcast %3 : vector<1x32xf32> to vector<2x32xf32>
    %173 = arith.addf %171, %172 : vector<2x32xf32>
    %cst_157 = arith.constant 0.000000e+00 : f32
    %174 = vector.broadcast %cst_157 : f32 to vector<2x32xf32>
    %175 = arith.maximumf %173, %174 : vector<2x32xf32>
    %176 = arith.truncf %175 : vector<2x32xf32> to vector<2x32xbf16>
    %c0_158 = arith.constant 0 : index
    %c0_159 = arith.constant 0 : index
    %177 = vector.load %arg7[%c0_158, %c0_159] : memref<32x12xbf16, #tpu.memory_space<vmem>>, vector<32x12xbf16>
    %cst_160 = arith.constant dense<0.000000e+00> : vector<2x12xf32>
    %178 = tpu.matmul %176, %177, %cst_160 {dimension_numbers = #tpu.dot_dimension_numbers<[1], [0], [0], [1], [0, 0, 1, 1], [], []>} : vector<2x32xbf16>, vector<32x12xbf16>, vector<2x12xf32> -> vector<2x12xf32>
    %179 = vector.broadcast %4 : vector<1x12xf32> to vector<2x12xf32>
    %180 = arith.addf %178, %179 : vector<2x12xf32>
    %c0_161 = arith.constant 0 : index
    %c0_162 = arith.constant 0 : index
    %181 = vector.load %arg9[%c0_161, %c0_162] : memref<2x12xf32, #tpu.memory_space<vmem>>, vector<2x12xf32>
    tpu.vector_store %arg9[%c0_161, %c0_162], %180 {strides = array<i32>} : memref<2x12xf32, #tpu.memory_space<vmem>>, vector<2x12xf32>,
    return
  }
}

</mosaic_0001>

<bundles_post_ra>
// kernel: _dqn_forward.1
= control target key start
LH: loop header
LB: loop body
LE: loop exit
PB: predicated region body
PF: predicated region fallthrough
CT: control target
= control target key end

     0   :  { %vm100_vm0 = vcmask 1044480   ;;  %v3416_v0 = vmov 0.0   ;;  %vm101_vm1 = vcmask 1045504   ;;  %v3417_v2 = vmov 65535   ;;  %s4060_s0 = inlined_call_operand.vmem [shape: f32[98,27], index: 0, kind: input, shape index: {}]   ;;  %s4061_s1 = inlined_call_operand.vmem [shape: bf16[27,16], index: 1, kind: input, shape index: {}]   ;;  %s4062_s2 = inlined_call_operand.vmem [shape: bf16[9,18,98], index: 2, kind: input, shape index: {}]   ;;  %s4063_s3 = inlined_call_operand.vmem [shape: bf16[9,16,32], index: 3, kind: input, shape index: {}]   ;;  %s4064_s4 = inlined_call_operand.vmem [shape: bf16[9,2,18], index: 4, kind: input, shape index: {}]   ;;  %s4065_s5 = inlined_call_operand.vmem [shape: bf16[9,32,32], index: 5, kind: input, shape index: {}]   ;;  %s4066_s6 = inlined_call_operand.vmem [shape: bf16[32,32], index: 6, kind: input, shape index: {}]   ;;  %s4067_s7 = inlined_call_operand.vmem [shape: bf16[32,12], index: 7, kind: input, shape index: {}]   ;;  %s4068_s8 = inlined_call_operand.vmem [shape: f32[8,32], index: 8, kind: input, shape index: {}]   ;;  %s4069_s9 = inlined_call_operand.hbm [shape: f32[2,12], index: 9, kind: output, shape index: {}]  }
   0x1   :  { %2922 = vmatprep.subr.bf16.mxu0 %v3416_v0  ;;  %v3343_v1 = vld [vmem:[%s4061_s1 + $0x8] sm:$0x3f]   ;;  %v102_v3 = vsel %vm100_vm0, 4294967295, %v3417_v2  ;;  %vm3418_vm2 = vmmov 0   ;;  %v3344_v6 = vld [vmem:[%s4061_s1] sm:$0xff]   ;;  %vm78_vm3 = vcmask 220160  }
   0x2   :  { %v103_v4 = vsel %vm101_vm1, %v102_v3, 0  ;;  %2926 = vmatprep.mubr.msk.bf16.mxu0 %vm3418_vm2, %v3416_v0  ;;  %v39_v7 = vld [vmem:[%s4060_s0] sm:$0xff]  ;;  %v40_v8 = vld [vmem:[%s4060_s0 + $0x8] sm:$0xff]  ;;  %v41_v10 = vld [vmem:[%s4060_s0 + $0x10] sm:$0xff] }
   0x3   :  { %v105_v5 = vand.u32 %v3343_v1, %v103_v4  ;;  %v52_v9 = vpack.c.bf16 %v40_v8, %v39_v7  ;;  %v42_v11 = vld [vmem:[%s4060_s0 + $0x18] sm:$0xff]  ;;  %v43_v13 = vld [vmem:[%s4060_s0 + $0x20] sm:$0xff]  ;;  %v44_v14 = vld [vmem:[%s4060_s0 + $0x28] sm:$0xff] }
   0x4   :  { %v53_v12 = vpack.c.bf16 %v42_v11, %v41_v10  ;;  %v54_v15 = vpack.c.bf16 %v44_v14, %v43_v13  ;;  %v45_v16 = vld [vmem:[%s4060_s0 + $0x30] sm:$0xff]  ;;  %v46_v17 = vld [vmem:[%s4060_s0 + $0x38] sm:$0xff] }
   0x5   :  { %2923 = vmatpush3.bf16.msra.mxu0 %v105_v5  ;;  %v55_v18 = vpack.c.bf16 %v46_v17, %v45_v16 }
   0x6   :  { %2924 = vmatprep.subr.bf16.mxu0 %v3416_v0 }
   0x9   :  { %2925 = vmatpush3.bf16.msra.mxu0 %v3344_v6 }
   0xc   :  { %2927 = vmatmul.mubr.msk.bf16.vlgmr.msra.gmra.mxu0 %vm78_vm3, %v52_v9 }
   0xd   :  { %2930 = vmatprep.mubr.msk.bf16.mxu0 %vm3418_vm2, %v3416_v0 }
  0x14   :  { %2931 = vmatmul.mubr.msk.bf16.gmra.mxu0 %vm78_vm3, %v53_v12 }
  0x15   :  { %2934 = vmatprep.mubr.msk.bf16.mxu0 %vm3418_vm2, %v3416_v0 }
  0x1c   :  { %2935 = vmatmul.mubr.msk.bf16.gmra.mxu0 %vm78_vm3, %v54_v15 }
  0x1d   :  { %2938 = vmatprep.mubr.msk.bf16.mxu0 %vm3418_vm2, %v3416_v0 }
  0x24   :  { %2939 = vmatmul.mubr.msk.bf16.gmra.mxu0 %vm78_vm3, %v55_v18 }
  0x25   :  { %14 = vsyncpa [#allocation3], 0  ;;  %2942 = vmatprep.mubr.msk.bf16.mxu0 %vm3418_vm2, %v3416_v0  ;;  %v47_v19 = vld [vmem:[%s4060_s0 + $0x40] sm:$0xff]  ;;  %v48_v20 = vld [vmem:[%s4060_s0 + $0x48] sm:$0xff]  ;;  %vm226_vm4 = vcmask 801792   ;;  %vm233_vm5 = vcmask 1040384  }
  0x26   :  { %v56_v21 = vpack.c.bf16 %v48_v20, %v47_v19  ;;  %v49_v22 = vld [vmem:[%s4060_s0 + $0x50] sm:$0xff]  ;;  %v50_v23 = vld [vmem:[%s4060_s0 + $0x58] sm:$0xff]  ;;  %v51_v25 = vld [vmem:[%s4060_s0 + $0x60] sm:$0x3]  ;;  %vm366_vm6 = vcmask 130048   ;;  %vm1432_vm7 = vcmask 146432  }
  0x27   :  { %v57_v24 = vpack.c.bf16 %v50_v23, %v49_v22  ;;  %v58_v26 = vpack.c.bf16 %v51_v25, %v51_v25  ;;  %v3345_v27 = vld [vmem:[%s4063_s3 + $0x8] sm:$0xff]   ;;  %v3346_v28 = vld [vmem:[%s4062_s2] sm:$0xff]   ;;  %vm1547_vm8 = vcmask 261120   ;;  %s3419_s18 = smov [#allocation2]   ;;  %vm2530_vm9 = vcmask 91136  }
  0x28   :  { %2990 = vmatprep.subr.bf16.mxu0 %v3345_v27  ;;  %2968 = vmatprep.mubr.msk.bf16.mxu1 %vm226_vm4, %v3346_v28  ;;  %v3548_v29 = vld [vmem:[%s4068_s8] ss:$0 sm:$0xff] }
  0x29   :  { %2991 = vmatpush3.bf16.msra.mxu0 %v3345_v27 }
  0x2c   :  { %2943 = vmatmul.mubr.msk.bf16.gmra.mxu0 %vm78_vm3, %v56_v21 }
  0x2d   :  { %2946 = vmatprep.mubr.msk.bf16.mxu0 %vm3418_vm2, %v3416_v0 }
  0x34   :  { %2947 = vmatmul.mubr.msk.bf16.gmra.mxu0 %vm78_vm3, %v57_v24 }
  0x35   :  { %2950 = vmatprep.mubr.msk.bf16.mxu0 %vm3418_vm2, %v3416_v0 }
  0x3c   :  { %2951 = vmatmul.mubr.msk.bf16.gmra.mxu0 %vm78_vm3, %v58_v26 }
  0xcc   :  { %v141_v30 = vpop.f32.mrf.mxu0 }
  0xcd   :  { %v142_v32 = vadd.f32 %v3548_v29, %v141_v30  ;;  %v3348_v30 = vld [vmem:[%s4062_s2 + $0xc] sm:$0xff]  }
  0xce   :  { %v2928_v31 = vpop.f32.mrf.mxu0 }
  0xcf   :  { %v195_v36 = vmax.f32 %v142_v32, 0.0  ;;  %v3349_v31 = vld [vmem:[%s4062_s2 + $0x14] ss:$0 sps:$4 sm:$0x11]   ;;  %v3350_v32 = vld [vmem:[%s4063_s3] sm:$0xff]  }
  0xd0   :  { %v144_v33 = vpop.f32.mrf.mxu0 }
  0xd1   :  { %v145_v34 = vadd.f32 %v3548_v29, %v144_v33  ;;  %v3351_v33 = vld [vmem:[%s4063_s3 + $0x10] sm:$0xff]  }
  0xd2   :  { %v2929_v35 = vpop.f32.mrf.mxu0 }
  0xd3   :  { %v196_v37 = vmax.f32 %v145_v34, 0.0 }
  0xd4   :  { %v149_v38 = vpop.f32.mrf.mxu0 }
  0xd5   :  { %v3552_v39 = vpack.c.bf16 %v196_v37, %v195_v36  ;;  %v150_v23 = vadd.f32 %v3548_v29, %v149_v38 }
  0xd6   :  { %v2932_v40 = vpop.f32.mrf.mxu0 }
  0xd7   :  { %v197_v27 = vmax.f32 %v150_v23, 0.0 }
  0xd8   :  { %v152_v41 = vpop.f32.mrf.mxu0 }
  0xd9   :  { %v153_v20 = vadd.f32 %v3548_v29, %v152_v41 }
  0xda   :  { %v2933_v42 = vpop.f32.mrf.mxu0 }
  0xdb   :  { %v198_v25 = vmax.f32 %v153_v20, 0.0 }
  0xdc   :  { %v157_v43 = vpop.f32.mrf.mxu0 }
  0xdd   :  { %v158_v18 = vadd.f32 %v3548_v29, %v157_v43  ;;  %v3591_v28 = vpack.c.bf16 %v198_v25, %v197_v27  ;;  %v3360_v27 = vld [vmem:[%s4063_s3 + $0x28] sm:$0xff]  }
  0xde   :  { %v2936_v44 = vpop.f32.mrf.mxu0 }
  0xdf   :  { %v199_v24 = vmax.f32 %v158_v18, 0.0 }
  0xe0   :  { %v160_v45 = vpop.f32.mrf.mxu0 }
  0xe1   :  { %v161_v15 = vadd.f32 %v3548_v29, %v160_v45 }
  0xe2   :  { %v2937_v46 = vpop.f32.mrf.mxu0 }
  0xe3   :  { %v200_v21 = vmax.f32 %v161_v15, 0.0  ;;  %v3352_v46 = vld [vmem:[%s4062_s2 + $0x18] sm:$0xff]  }
  0xe4   :  { %v165_v47 = vpop.f32.mrf.mxu0 }
  0xe5   :  { %v166_v13 = vadd.f32 %v3548_v29, %v165_v47  ;;  %v3587_v26 = vpack.c.bf16 %v200_v21, %v199_v24  ;;  %v3358_v24 = vld [vmem:[%s4062_s2 + $0x30] sm:$0xff]  }
  0xe6   :  { %v2940_v48 = vpop.f32.mrf.mxu0 }
  0xe7   :  { %v201_v19 = vmax.f32 %v166_v13, 0.0  ;;  %v3354_v48 = vld [vmem:[%s4063_s3 + $0x18] sm:$0xff]  }
  0xe8   :  { %v168_v49 = vpop.f32.mrf.mxu0 }
  0xe9   :  { %v169_v9 = vadd.f32 %v3548_v29, %v168_v49  ;;  %v3353_v49 = vld [vmem:[%s4062_s2 + $0x20] ss:$0 sps:$4 sm:$0x11]  }
  0xea   :  { %v2941_v50 = vpop.f32.mrf.mxu0 }
  0xeb   :  { %v202_v16 = vmax.f32 %v169_v9, 0.0 }
  0xec   :  { %v173_v51 = vpop.f32.mrf.mxu0 }
  0xed   :  { %v174_v5 = vadd.f32 %v3548_v29, %v173_v51  ;;  %v3582_v22 = vpack.c.bf16 %v202_v16, %v201_v19 }
  0xee   :  { %v2944_v52 = vpop.f32.mrf.mxu0 }
  0xef   :  { %v203_v14 = vmax.f32 %v174_v5, 0.0 }
  0xf0   :  { %v176_v53 = vpop.f32.mrf.mxu0 }
  0xf1   :  { %v177_v1 = vadd.f32 %v3548_v29, %v176_v53 }
  0xf2   :  { %v2945_v54 = vpop.f32.mrf.mxu0 }
  0xf3   :  { %v204_v10 = vmax.f32 %v177_v1, 0.0  ;;  %v3355_v1 = vld [vmem:[%s4062_s2 + $0x24] sm:$0xff]  }
  0xf4   :  { %v181_v55 = vpop.f32.mrf.mxu0 }
  0xf5   :  { %v182_v61 = vadd.f32 %v3548_v29, %v181_v55  ;;  %v3576_v17 = vpack.c.bf16 %v204_v10, %v203_v14 }
  0xf6   :  { %v2948_v56 = vpop.f32.mrf.mxu0 }
  0xf7   :  { %v205_v6 = vmax.f32 %v182_v61, 0.0 }
  0xf8   :  { %v184_v57 = vpop.f32.mrf.mxu0 }
  0xf9   :  { %v185_v59 = vadd.f32 %v3548_v29, %v184_v57 }
  0xfa   :  { %v2949_v58 = vpop.f32.mrf.mxu0 }
  0xfb   :  { %v206_v2 = vmax.f32 %v185_v59, 0.0 }
  0xfc   :  { %v189_v60 = vpop.f32.mrf.mxu0 }
  0xfd   :  { %v190_v62 = vadd.f32 %v3548_v29, %v189_v60  ;;  %v3562_v11 = vpack.c.bf16 %v206_v2, %v205_v6  ;;  %v3347_v29 = vld [vmem:[%s4062_s2 + $0x8] ss:$0 sps:$4 sm:$0x11]  }
  0xfe   :  { %v2952_v63 = vpop.f32.mrf.mxu0 }
  0xff   :  { %v207_v3 = vmax.f32 %v190_v62, 0.0 }
 0x100   :  { %v192_v4 = vpop.f32.mrf.mxu0 }
 0x101   :  { %v3559_v7 = vpack.c.bf16 %v207_v3, %v207_v3  ;;  %v3357_v3 = vld [vmem:[%s4063_s3 + $0x20] sm:$0xff]   ;;  %v3356_v4 = vld [vmem:[%s4062_s2 + $0x2c] ss:$0 sps:$4 sm:$0x11]  }
 0x102   :  { %v2953_v8 = vpop.f32.mrf.mxu0 }
 0x103   :  { %3330 = vmatprep.subr.msk.bf16.mxu1 %vm233_vm5, %v3559_v7  ;;  %3332 = vmatprep.subr.msk.bf16.mxu0 %vm233_vm5, %v3559_v7  ;;  %v3570_v12 = vsel %vm233_vm5, %v3559_v7, 0 }
 0x104   :  { %2955 = vmatpush3.bf16.msra.mxu1 %v3570_v12 }
 0x105   :  { %2956 = vmatprep.subr.bf16.mxu1 %v3562_v11 }
 0x108   :  { %2957 = vmatpush3.bf16.msra.mxu1 %v3562_v11 }
 0x109   :  { %2958 = vmatprep.subr.bf16.mxu1 %v3576_v17 }
 0x10c   :  { %2959 = vmatpush3.bf16.msra.mxu1 %v3576_v17 }
 0x10d   :  { %2960 = vmatprep.subr.bf16.mxu1 %v3582_v22 }
 0x110   :  { %2961 = vmatpush3.bf16.msra.mxu1 %v3582_v22 }
 0x111   :  { %2962 = vmatprep.subr.bf16.mxu1 %v3587_v26 }
 0x114   :  { %2963 = vmatpush3.bf16.msra.mxu1 %v3587_v26 }
 0x115   :  { %2964 = vmatprep.subr.bf16.mxu1 %v3591_v28 }
 0x118   :  { %2965 = vmatpush3.bf16.msra.mxu1 %v3591_v28 }
 0x119   :  { %2966 = vmatprep.subr.bf16.mxu1 %v3552_v39 }
 0x11c   :  { %2967 = vmatpush3.bf16.msra.mxu1 %v3552_v39 }
 0x11d   :  { %3331 = vmatprep.subr.msk.bf16.mxu1 %vm233_vm5, %v3559_v7 }
 0x11f   :  { %2969 = vmatmul.mubr.msk.bf16.vlgmr.msra.gmra.mxu1 %vm226_vm4, %v3347_v29  ;;  %v3359_v29 = vld [vmem:[%s4062_s2 + $0x38] ss:$0 sps:$4 sm:$0x11]  }
 0x120   :  { %2973 = vmatpush3.bf16.msra.mxu1 %v3570_v12  ;;  %2986 = vmatprep.mubr.msk.bf16.mxu1 %vm226_vm4, %v3348_v30 }
 0x121   :  { %2974 = vmatprep.subr.bf16.mxu1 %v3562_v11 }
 0x124   :  { %2975 = vmatpush3.bf16.msra.mxu1 %v3562_v11 }
 0x125   :  { %2976 = vmatprep.subr.bf16.mxu1 %v3576_v17 }
 0x128   :  { %2977 = vmatpush3.bf16.msra.mxu1 %v3576_v17 }
 0x129   :  { %2978 = vmatprep.subr.bf16.mxu1 %v3582_v22 }
 0x12c   :  { %2979 = vmatpush3.bf16.msra.mxu1 %v3582_v22 }
 0x12d   :  { %2980 = vmatprep.subr.bf16.mxu1 %v3587_v26 }
 0x130   :  { %2981 = vmatpush3.bf16.msra.mxu1 %v3587_v26 }
 0x131   :  { %2982 = vmatprep.subr.bf16.mxu1 %v3591_v28 }
 0x134   :  { %2983 = vmatpush3.bf16.msra.mxu1 %v3591_v28 }
 0x135   :  { %2984 = vmatprep.subr.bf16.mxu1 %v3552_v39 }
 0x138   :  { %2985 = vmatpush3.bf16.msra.mxu1 %v3552_v39 }
 0x139   :  { %2996 = vmatprep.subr.bf16.mxu1 %v3350_v32 }
 0x13b   :  { %2987 = vmatmul.mubr.msk.bf16.vlgmr.msra.gmra.mxu1 %vm226_vm4, %v3349_v31 }
 0x13c   :  { %2997 = vmatpush3.bf16.msra.mxu1 %v3350_v32 }
 0x13d   :  { %3020 = vmatprep.subr.bf16.mxu1 %v3351_v33 }
 0x1df   :  { %v2970_v34 = vpop.f32.mrf.mxu1 }
 0x1e0   :  { %v286_v40 = vpack.c.bf16 %v2970_v34, %v2970_v34 }
 0x1e1   :  { %v271_v35 = vpop.f32.mrf.mxu1 }
 0x1e3   :  { %v2971_v36 = vpop.f32.mrf.mxu1 }
 0x1e5   :  { %v274_v37 = vpop.f32.mrf.mxu1 }
 0x1e6   :  { %v285_v38 = vpack.c.bf16 %v274_v37, %v271_v35 }
 0x1e8   :  { %2998 = vmatprep.mubr.msk.bf16.mxu1 %vm366_vm6, %v285_v38 }
 0x1e9   :  { %2999 = vmatmul.mubr.msk.bf16.vlgmr.msra.gmra.mxu1 %vm366_vm6, %v286_v40 }
 0x1ea   :  { %3021 = vmatpush3.bf16.msra.mxu1 %v3351_v33 }
 0x1eb   :  { %3333 = vmatprep.subr.msk.bf16.mxu1 %vm233_vm5, %v3559_v7 }
 0x1fb   :  { %v2988_v41 = vpop.f32.mrf.mxu1 }
 0x1fc   :  { %v356_v47 = vpack.c.bf16 %v2988_v41, %v2988_v41 }
 0x1fd   :  { %v341_v42 = vpop.f32.mrf.mxu1 }
 0x1ff   :  { %v2989_v43 = vpop.f32.mrf.mxu1 }
 0x200   :  { %v3361_v43 = vld [vmem:[%s4062_s2 + $0x3c] sm:$0xff]  }
 0x201   :  { %v344_v44 = vpop.f32.mrf.mxu1 }
 0x202   :  { %v355_v45 = vpack.c.bf16 %v344_v44, %v341_v42 }
 0x204   :  { %2992 = vmatprep.mubr.msk.bf16.mxu0 %vm366_vm6, %v355_v45  ;;  %v3363_v45 = vld [vmem:[%s4063_s3 + $0x30] sm:$0xff]  }
 0x205   :  { %2993 = vmatmul.mubr.msk.bf16.vlgmr.msra.gmra.mxu0 %vm366_vm6, %v356_v47 }
 0x206   :  { %3003 = vmatpush3.bf16.msra.mxu0 %v3570_v12  ;;  %3016 = vmatprep.mubr.msk.bf16.mxu0 %vm226_vm4, %v3352_v46  ;;  %v3362_v46 = vld [vmem:[%s4062_s2 + $0x44] ss:$0 sps:$4 sm:$0x11]  }
 0x207   :  { %3004 = vmatprep.subr.bf16.mxu0 %v3562_v11 }
 0x20a   :  { %3005 = vmatpush3.bf16.msra.mxu0 %v3562_v11 }
 0x20b   :  { %3006 = vmatprep.subr.bf16.mxu0 %v3576_v17 }
 0x20e   :  { %3007 = vmatpush3.bf16.msra.mxu0 %v3576_v17 }
 0x20f   :  { %3008 = vmatprep.subr.bf16.mxu0 %v3582_v22 }
 0x212   :  { %3009 = vmatpush3.bf16.msra.mxu0 %v3582_v22 }
 0x213   :  { %3010 = vmatprep.subr.bf16.mxu0 %v3587_v26 }
 0x216   :  { %3011 = vmatpush3.bf16.msra.mxu0 %v3587_v26 }
 0x217   :  { %3012 = vmatprep.subr.bf16.mxu0 %v3591_v28 }
 0x21a   :  { %3013 = vmatpush3.bf16.msra.mxu0 %v3591_v28 }
 0x21b   :  { %3014 = vmatprep.subr.bf16.mxu0 %v3552_v39 }
 0x21e   :  { %3015 = vmatpush3.bf16.msra.mxu0 %v3552_v39 }
 0x21f   :  { %3044 = vmatprep.subr.bf16.mxu0 %v3354_v48 }
 0x221   :  { %3017 = vmatmul.mubr.msk.bf16.vlgmr.msra.gmra.mxu0 %vm226_vm4, %v3353_v49 }
 0x222   :  { %3045 = vmatpush3.bf16.msra.mxu0 %v3354_v48 }
 0x223   :  { %3334 = vmatprep.subr.msk.bf16.mxu0 %vm233_vm5, %v3559_v7 }
 0x2a9   :  { %v3000_v50 = vpop.f32.mrf.mxu1 }
 0x2ab   :  { %v467_v51 = vpop.f32.mrf.mxu1 }
 0x2ad   :  { %v3001_v52 = vpop.f32.mrf.mxu1 }
 0x2af   :  { %v470_v5 = vpop.f32.mrf.mxu1 }
 0x2c5   :  { %v2994_v53 = vpop.f32.mrf.mxu0 }
 0x2c6   :  { %v476_v54 = vadd.f32 %v3000_v50, %v2994_v53 }
 0x2c7   :  { %v407_v55 = vpop.f32.mrf.mxu0 }
 0x2c8   :  { %v468_v56 = vadd.f32 %v467_v51, %v407_v55 }
 0x2c9   :  { %v2995_v57 = vpop.f32.mrf.mxu0 }
 0x2cb   :  { %v410_v58 = vpop.f32.mrf.mxu0 }
 0x2cc   :  { %v471_v14 = vadd.f32 %v470_v5, %v410_v58 }
 0x2e1   :  { %v3018_v59 = vpop.f32.mrf.mxu0 }
 0x2e2   :  { %v548_v2 = vpack.c.bf16 %v3018_v59, %v3018_v59  ;;  %v3364_v59 = vld [vmem:[%s4062_s2 + $0x48] sm:$0xff]  }
 0x2e3   :  { %v533_v60 = vpop.f32.mrf.mxu0 }
 0x2e5   :  { %v3019_v61 = vpop.f32.mrf.mxu0 }
 0x2e6   :  { %v3366_v61 = vld [vmem:[%s4063_s3 + $0x38] sm:$0xff]  }
 0x2e7   :  { %v536_v62 = vpop.f32.mrf.mxu0 }
 0x2e8   :  { %v547_v63 = vpack.c.bf16 %v536_v62, %v533_v60  ;;  %v3365_v62 = vld [vmem:[%s4062_s2 + $0x50] ss:$0 sps:$4 sm:$0x11]  }
 0x2ea   :  { %3022 = vmatprep.mubr.msk.bf16.mxu1 %vm366_vm6, %v547_v63 }
 0x2eb   :  { %3023 = vmatmul.mubr.msk.bf16.vlgmr.msra.gmra.mxu1 %vm366_vm6, %v548_v2 }
 0x2ec   :  { %3027 = vmatpush3.bf16.msra.mxu1 %v3570_v12  ;;  %3040 = vmatprep.mubr.msk.bf16.mxu1 %vm226_vm4, %v3355_v1 }
 0x2ed   :  { %3028 = vmatprep.subr.bf16.mxu1 %v3562_v11 }
 0x2f0   :  { %3029 = vmatpush3.bf16.msra.mxu1 %v3562_v11 }
 0x2f1   :  { %3030 = vmatprep.subr.bf16.mxu1 %v3576_v17 }
 0x2f4   :  { %3031 = vmatpush3.bf16.msra.mxu1 %v3576_v17 }
 0x2f5   :  { %3032 = vmatprep.subr.bf16.mxu1 %v3582_v22 }
 0x2f8   :  { %3033 = vmatpush3.bf16.msra.mxu1 %v3582_v22 }
 0x2f9   :  { %3034 = vmatprep.subr.bf16.mxu1 %v3587_v26 }
 0x2fc   :  { %3035 = vmatpush3.bf16.msra.mxu1 %v3587_v26 }
 0x2fd   :  { %3036 = vmatprep.subr.bf16.mxu1 %v3591_v28 }
 0x300   :  { %3037 = vmatpush3.bf16.msra.mxu1 %v3591_v28 }
 0x301   :  { %3038 = vmatprep.subr.bf16.mxu1 %v3552_v39 }
 0x304   :  { %3039 = vmatpush3.bf16.msra.mxu1 %v3552_v39 }
 0x305   :  { %3068 = vmatprep.subr.bf16.mxu1 %v3357_v3 }
 0x307   :  { %3041 = vmatmul.mubr.msk.bf16.vlgmr.msra.gmra.mxu1 %vm226_vm4, %v3356_v4 }
 0x308   :  { %3069 = vmatpush3.bf16.msra.mxu1 %v3357_v3 }
 0x309   :  { %3335 = vmatprep.subr.msk.bf16.mxu1 %vm233_vm5, %v3559_v7 }
 0x3ab   :  { %v3024_v6 = vpop.f32.mrf.mxu1 }
 0x3ac   :  { %v614_v8 = vadd.f32 %v3024_v6, %v476_v54 }
 0x3ad   :  { %v598_v9 = vpop.f32.mrf.mxu1 }
 0x3ae   :  { %v612_v10 = vadd.f32 %v598_v9, %v468_v56 }
 0x3af   :  { %v3025_v13 = vpop.f32.mrf.mxu1 }
 0x3b1   :  { %v601_v15 = vpop.f32.mrf.mxu1 }
 0x3b2   :  { %v613_v16 = vadd.f32 %v601_v15, %v471_v14  ;;  %v3367_v15 = vld [vmem:[%s4062_s2 + $0x54] sm:$0xff]  }
 0x3c7   :  { %v3042_v18 = vpop.f32.mrf.mxu1 }
 0x3c8   :  { %v682_v25 = vpack.c.bf16 %v3042_v18, %v3042_v18 }
 0x3c9   :  { %v667_v19 = vpop.f32.mrf.mxu1 }
 0x3cb   :  { %v3043_v20 = vpop.f32.mrf.mxu1 }
 0x3cd   :  { %v670_v21 = vpop.f32.mrf.mxu1 }
 0x3ce   :  { %v681_v23 = vpack.c.bf16 %v670_v21, %v667_v19 }
 0x3d0   :  { %3046 = vmatprep.mubr.msk.bf16.mxu0 %vm366_vm6, %v681_v23 }
 0x3d1   :  { %3047 = vmatmul.mubr.msk.bf16.vlgmr.msra.gmra.mxu0 %vm366_vm6, %v682_v25 }
 0x3d2   :  { %3051 = vmatpush3.bf16.msra.mxu0 %v3570_v12  ;;  %3064 = vmatprep.mubr.msk.bf16.mxu0 %vm226_vm4, %v3358_v24 }
 0x3d3   :  { %3052 = vmatprep.subr.bf16.mxu0 %v3562_v11 }
 0x3d6   :  { %3053 = vmatpush3.bf16.msra.mxu0 %v3562_v11 }
 0x3d7   :  { %3054 = vmatprep.subr.bf16.mxu0 %v3576_v17 }
 0x3da   :  { %3055 = vmatpush3.bf16.msra.mxu0 %v3576_v17 }
 0x3db   :  { %3056 = vmatprep.subr.bf16.mxu0 %v3582_v22 }
 0x3de   :  { %3057 = vmatpush3.bf16.msra.mxu0 %v3582_v22 }
 0x3df   :  { %3058 = vmatprep.subr.bf16.mxu0 %v3587_v26 }
 0x3e2   :  { %3059 = vmatpush3.bf16.msra.mxu0 %v3587_v26 }
 0x3e3   :  { %3060 = vmatprep.subr.bf16.mxu0 %v3591_v28 }
 0x3e6   :  { %3061 = vmatpush3.bf16.msra.mxu0 %v3591_v28 }
 0x3e7   :  { %3062 = vmatprep.subr.bf16.mxu0 %v3552_v39 }
 0x3ea   :  { %3063 = vmatpush3.bf16.msra.mxu0 %v3552_v39 }
 0x3eb   :  { %3092 = vmatprep.subr.bf16.mxu0 %v3360_v27 }
 0x3ed   :  { %3065 = vmatmul.mubr.msk.bf16.vlgmr.msra.gmra.mxu0 %vm226_vm4, %v3359_v29 }
 0x3ee   :  { %3093 = vmatpush3.bf16.msra.mxu0 %v3360_v27 }
 0x3ef   :  { %3336 = vmatprep.subr.msk.bf16.mxu0 %vm233_vm5, %v3559_v7 }
 0x491   :  { %v3048_v30 = vpop.f32.mrf.mxu0 }
 0x492   :  { %v748_v31 = vadd.f32 %v3048_v30, %v614_v8 }
 0x493   :  { %v732_v32 = vpop.f32.mrf.mxu0 }
 0x494   :  { %v746_v33 = vadd.f32 %v732_v32, %v612_v10 }
 0x495   :  { %v3049_v34 = vpop.f32.mrf.mxu0 }
 0x497   :  { %v735_v35 = vpop.f32.mrf.mxu0 }
 0x498   :  { %v747_v36 = vadd.f32 %v735_v35, %v613_v16 }
 0x4ad   :  { %v3066_v37 = vpop.f32.mrf.mxu0 }
 0x4ae   :  { %v816_v44 = vpack.c.bf16 %v3066_v37, %v3066_v37 }
 0x4af   :  { %v801_v38 = vpop.f32.mrf.mxu0 }
 0x4b1   :  { %v3067_v40 = vpop.f32.mrf.mxu0 }
 0x4b3   :  { %v804_v41 = vpop.f32.mrf.mxu0 }
 0x4b4   :  { %v815_v42 = vpack.c.bf16 %v804_v41, %v801_v38 }
 0x4b6   :  { %3070 = vmatprep.mubr.msk.bf16.mxu1 %vm366_vm6, %v815_v42 }
 0x4b7   :  { %3071 = vmatmul.mubr.msk.bf16.vlgmr.msra.gmra.mxu1 %vm366_vm6, %v816_v44  ;;  %v3372_v44 = vld [vmem:[%s4065_s5 + $0x8] sm:$0xff]  }
 0x4b8   :  { %3075 = vmatpush3.bf16.msra.mxu1 %v3570_v12  ;;  %3088 = vmatprep.mubr.msk.bf16.mxu1 %vm226_vm4, %v3361_v43 }
 0x4b9   :  { %3076 = vmatprep.subr.bf16.mxu1 %v3562_v11 }
 0x4bc   :  { %3077 = vmatpush3.bf16.msra.mxu1 %v3562_v11 }
 0x4bd   :  { %3078 = vmatprep.subr.bf16.mxu1 %v3576_v17 }
 0x4c0   :  { %3079 = vmatpush3.bf16.msra.mxu1 %v3576_v17 }
 0x4c1   :  { %3080 = vmatprep.subr.bf16.mxu1 %v3582_v22 }
 0x4c4   :  { %3081 = vmatpush3.bf16.msra.mxu1 %v3582_v22 }
 0x4c5   :  { %3082 = vmatprep.subr.bf16.mxu1 %v3587_v26 }
 0x4c8   :  { %3083 = vmatpush3.bf16.msra.mxu1 %v3587_v26 }
 0x4c9   :  { %3084 = vmatprep.subr.bf16.mxu1 %v3591_v28 }
 0x4cc   :  { %3085 = vmatpush3.bf16.msra.mxu1 %v3591_v28 }
 0x4cd   :  { %3086 = vmatprep.subr.bf16.mxu1 %v3552_v39 }
 0x4d0   :  { %3087 = vmatpush3.bf16.msra.mxu1 %v3552_v39 }
 0x4d1   :  { %3116 = vmatprep.subr.bf16.mxu1 %v3363_v45 }
 0x4d3   :  { %3089 = vmatmul.mubr.msk.bf16.vlgmr.msra.gmra.mxu1 %vm226_vm4, %v3362_v46 }
 0x4d4   :  { %3117 = vmatpush3.bf16.msra.mxu1 %v3363_v45  ;;  %v2659_v45 = vld [vmem:[%s4068_s8 + $0x1] ss:$0 sm:$0xff] }
 0x4d5   :  { %3337 = vmatprep.subr.msk.bf16.mxu1 %vm233_vm5, %v3559_v7 }
 0x577   :  { %v3072_v47 = vpop.f32.mrf.mxu1 }
 0x578   :  { %v882_v48 = vadd.f32 %v3072_v47, %v748_v31 }
 0x579   :  { %v866_v49 = vpop.f32.mrf.mxu1 }
 0x57a   :  { %v880_v50 = vadd.f32 %v866_v49, %v746_v33  ;;  %v3369_v33 = vld [vmem:[%s4062_s2 + $0x60] sm:$0xff]  }
 0x57b   :  { %v3073_v51 = vpop.f32.mrf.mxu1 }
 0x57d   :  { %v869_v52 = vpop.f32.mrf.mxu1 }
 0x57e   :  { %v881_v53 = vadd.f32 %v869_v52, %v747_v36 }
 0x593   :  { %v3090_v54 = vpop.f32.mrf.mxu1 }
 0x594   :  { %v950_v60 = vpack.c.bf16 %v3090_v54, %v3090_v54 }
 0x595   :  { %v935_v55 = vpop.f32.mrf.mxu1 }
 0x597   :  { %v3091_v56 = vpop.f32.mrf.mxu1 }
 0x599   :  { %v938_v57 = vpop.f32.mrf.mxu1 }
 0x59a   :  { %v949_v58 = vpack.c.bf16 %v938_v57, %v935_v55 }
 0x59c   :  { %3094 = vmatprep.mubr.msk.bf16.mxu0 %vm366_vm6, %v949_v58 }
 0x59d   :  { %3095 = vmatmul.mubr.msk.bf16.vlgmr.msra.gmra.mxu0 %vm366_vm6, %v950_v60 }
 0x59e   :  { %3099 = vmatpush3.bf16.msra.mxu0 %v3570_v12  ;;  %3112 = vmatprep.mubr.msk.bf16.mxu0 %vm226_vm4, %v3364_v59 }
 0x59f   :  { %3100 = vmatprep.subr.bf16.mxu0 %v3562_v11 }
 0x5a2   :  { %3101 = vmatpush3.bf16.msra.mxu0 %v3562_v11 }
 0x5a3   :  { %3102 = vmatprep.subr.bf16.mxu0 %v3576_v17 }
 0x5a6   :  { %3103 = vmatpush3.bf16.msra.mxu0 %v3576_v17 }
 0x5a7   :  { %3104 = vmatprep.subr.bf16.mxu0 %v3582_v22 }
 0x5aa   :  { %3105 = vmatpush3.bf16.msra.mxu0 %v3582_v22 }
 0x5ab   :  { %3106 = vmatprep.subr.bf16.mxu0 %v3587_v26 }
 0x5ae   :  { %3107 = vmatpush3.bf16.msra.mxu0 %v3587_v26 }
 0x5af   :  { %3108 = vmatprep.subr.bf16.mxu0 %v3591_v28 }
 0x5b2   :  { %3109 = vmatpush3.bf16.msra.mxu0 %v3591_v28 }
 0x5b3   :  { %3110 = vmatprep.subr.bf16.mxu0 %v3552_v39 }
 0x5b6   :  { %3111 = vmatpush3.bf16.msra.mxu0 %v3552_v39 }
 0x5b7   :  { %3140 = vmatprep.subr.bf16.mxu0 %v3366_v61 }
 0x5b9   :  { %3113 = vmatmul.mubr.msk.bf16.vlgmr.msra.gmra.mxu0 %vm226_vm4, %v3365_v62  ;;  %v1431_v62 = vld [vmem:[%s4064_s4] sm:$0x1] }
 0x5ba   :  { %3141 = vmatpush3.bf16.msra.mxu0 %v3366_v61 }
 0x5bb   :  { %3338 = vmatprep.subr.msk.bf16.mxu0 %vm233_vm5, %v3559_v7  ;;  %v3368_v7 = vld [vmem:[%s4062_s2 + $0x5c] ss:$0 sps:$4 sm:$0x11]  }
 0x65d   :  { %v3096_v63 = vpop.f32.mrf.mxu0 }
 0x65e   :  { %v1016_v1 = vadd.f32 %v3096_v63, %v882_v48  ;;  %v2661_v63 = vld [vmem:[%s4064_s4 + $0x1] sm:$0x1] }
 0x65f   :  { %v1000_v2 = vpop.f32.mrf.mxu0 }
 0x660   :  { %v1014_v3 = vadd.f32 %v1000_v2, %v880_v50  ;;  %v3374_v2 = vld [vmem:[%s4065_s5 + $0x18] sm:$0xff]  }
 0x661   :  { %v3097_v4 = vpop.f32.mrf.mxu0 }
 0x663   :  { %v1003_v5 = vpop.f32.mrf.mxu0 }
 0x664   :  { %v1015_v6 = vadd.f32 %v1003_v5, %v881_v53 }
 0x679   :  { %v3114_v8 = vpop.f32.mrf.mxu0 }
 0x67a   :  { %v1084_v16 = vpack.c.bf16 %v3114_v8, %v3114_v8 }
 0x67b   :  { %v1069_v9 = vpop.f32.mrf.mxu0 }
 0x67d   :  { %v3115_v10 = vpop.f32.mrf.mxu0 }
 0x67f   :  { %v1072_v13 = vpop.f32.mrf.mxu0 }
 0x680   :  { %v1083_v14 = vpack.c.bf16 %v1072_v13, %v1069_v9 }
 0x682   :  { %3118 = vmatprep.mubr.msk.bf16.mxu1 %vm366_vm6, %v1083_v14 }
 0x683   :  { %3119 = vmatmul.mubr.msk.bf16.vlgmr.msra.gmra.mxu1 %vm366_vm6, %v1084_v16 }
 0x684   :  { %3123 = vmatpush3.bf16.msra.mxu1 %v3570_v12  ;;  %3136 = vmatprep.mubr.msk.bf16.mxu1 %vm226_vm4, %v3367_v15 }
 0x685   :  { %3124 = vmatprep.subr.bf16.mxu1 %v3562_v11 }
 0x688   :  { %3125 = vmatpush3.bf16.msra.mxu1 %v3562_v11 }
 0x689   :  { %3126 = vmatprep.subr.bf16.mxu1 %v3576_v17 }
 0x68c   :  { %3127 = vmatpush3.bf16.msra.mxu1 %v3576_v17 }
 0x68d   :  { %3128 = vmatprep.subr.bf16.mxu1 %v3582_v22 }
 0x690   :  { %3129 = vmatpush3.bf16.msra.mxu1 %v3582_v22 }
 0x691   :  { %3130 = vmatprep.subr.bf16.mxu1 %v3587_v26 }
 0x694   :  { %3131 = vmatpush3.bf16.msra.mxu1 %v3587_v26 }
 0x695   :  { %3132 = vmatprep.subr.bf16.mxu1 %v3591_v28 }
 0x698   :  { %3133 = vmatpush3.bf16.msra.mxu1 %v3591_v28 }
 0x699   :  { %3134 = vmatprep.subr.bf16.mxu1 %v3552_v39 }
 0x69c   :  { %3135 = vmatpush3.bf16.msra.mxu1 %v3552_v39 }
 0x69f   :  { %3137 = vmatmul.mubr.msk.bf16.vlgmr.msra.gmra.mxu1 %vm226_vm4, %v3368_v7  ;;  %v2673_v7 = vld [vmem:[%s4064_s4 + $0x2] sm:$0x1] }
 0x743   :  { %v3120_v18 = vpop.f32.mrf.mxu1 }
 0x744   :  { %v1150_v19 = vadd.f32 %v3120_v18, %v1016_v1  ;;  %v3373_v1 = vld [vmem:[%s4065_s5] sm:$0xff]  }
 0x745   :  { %v1134_v20 = vpop.f32.mrf.mxu1  ;;  %v2682_v18 = vld [vmem:[%s4064_s4 + $0x3] sm:$0x1] }
 0x746   :  { %v1148_v21 = vadd.f32 %v1134_v20, %v1014_v3  ;;  %v3375_v3 = vld [vmem:[%s4065_s5 + $0x10] sm:$0xff]   ;;  %v2700_v20 = vld [vmem:[%s4064_s4 + $0x5] sm:$0x1] }
 0x747   :  { %v3121_v23 = vpop.f32.mrf.mxu1 }
 0x748   :  { %v2718_v23 = vld [vmem:[%s4064_s4 + $0x7] sm:$0x1] }
 0x749   :  { %v1137_v24 = vpop.f32.mrf.mxu1 }
 0x74a   :  { %v1149_v25 = vadd.f32 %v1137_v24, %v1015_v6  ;;  %v2727_v24 = vld [vmem:[%s4064_s4 + $0x8] sm:$0x1] }
 0x75f   :  { %v3138_v27 = vpop.f32.mrf.mxu1 }
 0x760   :  { %v1218_v34 = vpack.c.bf16 %v3138_v27, %v3138_v27  ;;  %v3377_v27 = vld [vmem:[%s4065_s5 + $0x20] sm:$0xff]  }
 0x761   :  { %v1203_v29 = vpop.f32.mrf.mxu1 }
 0x763   :  { %v3139_v30 = vpop.f32.mrf.mxu1 }
 0x765   :  { %v1206_v31 = vpop.f32.mrf.mxu1 }
 0x766   :  { %v1217_v32 = vpack.c.bf16 %v1206_v31, %v1203_v29 }
 0x768   :  { %3142 = vmatprep.mubr.msk.bf16.mxu0 %vm366_vm6, %v1217_v32 }
 0x769   :  { %3143 = vmatmul.mubr.msk.bf16.vlgmr.msra.gmra.mxu0 %vm366_vm6, %v1218_v34 }
 0x76a   :  { %3147 = vmatpush3.bf16.msra.mxu0 %v3570_v12  ;;  %3160 = vmatprep.mubr.msk.bf16.mxu0 %vm226_vm4, %v3369_v33  ;;  %v3371_v12 = vld [vmem:[%s4063_s3 + $0x40] sm:$0xff]  }
 0x76b   :  { %3148 = vmatprep.subr.bf16.mxu0 %v3562_v11  ;;  %3164 = vmatprep.subr.bf16.mxu1 %v3371_v12 }
 0x76c   :  { %3165 = vmatpush3.bf16.msra.mxu1 %v3371_v12 }
 0x76d   :  { %3170 = vmatprep.subr.bf16.mxu1 %v3416_v0 }
 0x76e   :  { %3149 = vmatpush3.bf16.msra.mxu0 %v3562_v11  ;;  %v3370_v11 = vld [vmem:[%s4062_s2 + $0x68] ss:$0 sps:$4 sm:$0x11]  }
 0x76f   :  { %3150 = vmatprep.subr.bf16.mxu0 %v3576_v17 }
 0x772   :  { %3151 = vmatpush3.bf16.msra.mxu0 %v3576_v17 }
 0x773   :  { %3152 = vmatprep.subr.bf16.mxu0 %v3582_v22 }
 0x776   :  { %3153 = vmatpush3.bf16.msra.mxu0 %v3582_v22 }
 0x777   :  { %3154 = vmatprep.subr.bf16.mxu0 %v3587_v26 }
 0x77a   :  { %3155 = vmatpush3.bf16.msra.mxu0 %v3587_v26 }
 0x77b   :  { %3156 = vmatprep.subr.bf16.mxu0 %v3591_v28 }
 0x77e   :  { %3157 = vmatpush3.bf16.msra.mxu0 %v3591_v28 }
 0x77f   :  { %3158 = vmatprep.subr.bf16.mxu0 %v3552_v39 }
 0x782   :  { %3159 = vmatpush3.bf16.msra.mxu0 %v3552_v39 }
 0x783   :  { %3194 = vmatprep.subr.bf16.mxu0 %v3416_v0 }
 0x785   :  { %3161 = vmatmul.mubr.msk.bf16.vlgmr.msra.gmra.mxu0 %vm226_vm4, %v3370_v11 }
 0x786   :  { %3198 = vmatprep.mubr.msk.bf16.mxu0 %vm3418_vm2, %v3416_v0  ;;  %3195 = vmatpush3.bf16.msra.mxu0 %v3372_v44  ;;  %v3381_v44 = vld [vmem:[%s4065_s5 + $0x40] sm:$0xff]  }
 0x787   :  { %3196 = vmatprep.subr.bf16.mxu0 %v3416_v0 }
 0x78a   :  { %3197 = vmatpush3.bf16.msra.mxu0 %v3373_v1 }
 0x78b   :  { %3210 = vmatprep.subr.bf16.mxu0 %v3416_v0 }
 0x829   :  { %v3144_v17 = vpop.f32.mrf.mxu0 }
 0x82a   :  { %v1284_v22 = vadd.f32 %v3144_v17, %v1150_v19  ;;  %v2691_v19 = vld [vmem:[%s4064_s4 + $0x4] sm:$0x1] }
 0x82b   :  { %v1268_v26 = vpop.f32.mrf.mxu0 }
 0x82c   :  { %v1282_v28 = vadd.f32 %v1268_v26, %v1148_v21  ;;  %v2709_v21 = vld [vmem:[%s4064_s4 + $0x6] sm:$0x1]  ;;  %v3378_v26 = vld [vmem:[%s4065_s5 + $0x38] sm:$0xff]  }
 0x82d   :  { %v3145_v39 = vpop.f32.mrf.mxu0 }
 0x82f   :  { %v1271_v35 = vpop.f32.mrf.mxu0 }
 0x830   :  { %v1283_v36 = vadd.f32 %v1271_v35, %v1149_v25  ;;  %v3376_v25 = vld [vmem:[%s4065_s5 + $0x28] sm:$0xff]  }
 0x845   :  { %v3162_v37 = vpop.f32.mrf.mxu0 }
 0x846   :  { %v1352_v43 = vpack.c.bf16 %v3162_v37, %v3162_v37 }
 0x847   :  { %v1337_v38 = vpop.f32.mrf.mxu0 }
 0x849   :  { %v3163_v40 = vpop.f32.mrf.mxu0 }
 0x84a   :  { %v3380_v40 = vld [vmem:[%s4065_s5 + $0x48] sm:$0xff]  }
 0x84b   :  { %v1340_v41 = vpop.f32.mrf.mxu0 }
 0x84c   :  { %v1351_v42 = vpack.c.bf16 %v1340_v41, %v1337_v38 }
 0x84e   :  { %3166 = vmatprep.mubr.msk.bf16.mxu1 %vm366_vm6, %v1351_v42 }
 0x84f   :  { %3167 = vmatmul.mubr.msk.bf16.vlgmr.msra.gmra.mxu1 %vm366_vm6, %v1352_v43 }
 0x850   :  { %3174 = vmatprep.mubr.msk.bf16.mxu1 %vm3418_vm2, %v3416_v0 }
 0x90f   :  { %v3168_v46 = vpop.f32.mrf.mxu1 }
 0x910   :  { %v1418_v47 = vadd.f32 %v3168_v46, %v1284_v22 }
 0x911   :  { %v1402_v48 = vpop.f32.mrf.mxu1 }
 0x912   :  { %v1425_v49 = vadd.f32 %v2659_v45, %v1418_v47  ;;  %v1416_v50 = vadd.f32 %v1402_v48, %v1282_v28  ;;  %v3382_v47 = vld [vmem:[%s4065_s5 + $0x58] sm:$0xff]  }
 0x913   :  { %v3169_v51 = vpop.f32.mrf.mxu1 }
 0x914   :  { %v1428_v52 = vmax.f32 %v1425_v49, 0.0  ;;  %v1423_v55 = vadd.f32 %v2659_v45, %v1416_v50  ;;  %v3383_v51 = vld [vmem:[%s4065_s5 + $0x50] sm:$0xff]  }
 0x915   :  { %v1405_v53 = vpop.f32.mrf.mxu1 }
 0x916   :  { %v1430_v54 = vpack.c.bf16 %v1428_v52, %v1428_v52  ;;  %v1417_v56 = vadd.f32 %v1405_v53, %v1283_v36  ;;  %v1426_v59 = vmax.f32 %v1423_v55, 0.0  ;;  %v3379_v36 = vld [vmem:[%s4065_s5 + $0x30] sm:$0xff]  }
 0x918   :  { %v3840_v57 = vsel %vm233_vm5, %v1430_v54, 0  ;;  %v1424_v58 = vadd.f32 %v2659_v45, %v1417_v56  ;;  %v3384_v54 = vld [vmem:[%s4065_s5 + $0x68] sm:$0xff]  }
 0x919   :  { %3171 = vmatpush3.bf16.msra.mxu1 %v3840_v57 }
 0x91a   :  { %v1427_v60 = vmax.f32 %v1424_v58, 0.0  ;;  %3172 = vmatprep.subr.bf16.mxu1 %v3416_v0  ;;  %v3385_v58 = vld [vmem:[%s4065_s5 + $0x60] sm:$0xff]  }
 0x91c   :  { %v3844_v61 = vpack.c.bf16 %v1427_v60, %v1426_v59 }
 0x91e   :  { %3173 = vmatpush3.bf16.msra.mxu1 %v3844_v61 }
 0x91f   :  { %3178 = vmatprep.subr.bf16.mxu1 %v3416_v0 }
 0x921   :  { %3175 = vmatmul.mubr.msk.bf16.vlgmr.msra.gmra.mxu1 %vm1432_vm7, %v1431_v62 }
 0x922   :  { %3179 = vmatpush3.bf16.msra.mxu1 %v3840_v57  ;;  %3182 = vmatprep.mubr.msk.bf16.mxu1 %vm3418_vm2, %v3416_v0 }
 0x923   :  { %3180 = vmatprep.subr.bf16.mxu1 %v3416_v0 }
 0x926   :  { %3181 = vmatpush3.bf16.msra.mxu1 %v3844_v61 }
 0x927   :  { %3186 = vmatprep.subr.bf16.mxu1 %v3416_v0 }
 0x929   :  { %3183 = vmatmul.mubr.msk.bf16.vlgmr.msra.gmra.mxu1 %vm1432_vm7, %v2661_v63 }
 0x92a   :  { %3190 = vmatprep.mubr.msk.bf16.mxu1 %vm3418_vm2, %v3416_v0  ;;  %3187 = vmatpush3.bf16.msra.mxu1 %v3374_v2  ;;  %v3387_v2 = vld [vmem:[%s4065_s5 + $0x70] sm:$0xff]  }
 0x92b   :  { %3188 = vmatprep.subr.bf16.mxu1 %v3416_v0 }
 0x92e   :  { %3189 = vmatpush3.bf16.msra.mxu1 %v3375_v3 }
 0x92f   :  { %3202 = vmatprep.subr.bf16.mxu1 %v3416_v0 }
 0x9e1   :  { %v1473_v4 = vpop.f32.mrf.mxu1 }
 0x9e2   :  { %v1479_v5 = vpack.c.bf16 %v1473_v4, %v1473_v4 }
 0x9e3   :  { %v3176_v6 = vpop.f32.mrf.mxu1 }
 0x9e4   :  { %3199 = vmatmul.mubr.msk.bf16.vlgmr.msra.gmra.mxu0 %vm1547_vm8, %v1479_v5  ;;  %v3388_v5 = vld [vmem:[%s4065_s5 + $0x88] sm:$0xff]  }
 0x9e5   :  { %v1476_v8 = vpop.f32.mrf.mxu1  ;;  %3214 = vmatprep.mubr.msk.bf16.mxu0 %vm3418_vm2, %v3416_v0  ;;  %3211 = vmatpush3.bf16.msra.mxu0 %v3376_v25 }
 0x9e6   :  { %3212 = vmatprep.subr.bf16.mxu0 %v3416_v0 }
 0x9e7   :  { %v3177_v9 = vpop.f32.mrf.mxu1 }
 0x9e9   :  { %v1523_v10 = vpop.f32.mrf.mxu1  ;;  %3213 = vmatpush3.bf16.msra.mxu0 %v3377_v27 }
 0x9ea   :  { %v1529_v13 = vpack.c.bf16 %v1523_v10, %v1523_v10  ;;  %3226 = vmatprep.subr.bf16.mxu0 %v3416_v0  ;;  %v3389_v10 = vld [vmem:[%s4065_s5 + $0x80] sm:$0xff]  }
 0x9eb   :  { %v3184_v14 = vpop.f32.mrf.mxu1 }
 0x9ec   :  { %3191 = vmatmul.mubr.msk.bf16.vlgmr.msra.gmra.mxu1 %vm1547_vm8, %v1529_v13 }
 0x9ed   :  { %3203 = vmatpush3.bf16.msra.mxu1 %v3840_v57  ;;  %v1526_v15 = vpop.f32.mrf.mxu1  ;;  %3206 = vmatprep.mubr.msk.bf16.mxu1 %vm3418_vm2, %v3416_v0 }
 0x9ee   :  { %3204 = vmatprep.subr.bf16.mxu1 %v3416_v0 }
 0x9ef   :  { %v3185_v16 = vpop.f32.mrf.mxu1 }
 0x9f1   :  { %3205 = vmatpush3.bf16.msra.mxu1 %v3844_v61 }
 0x9f2   :  { %3218 = vmatprep.subr.bf16.mxu1 %v3416_v0 }
 0x9f4   :  { %3207 = vmatmul.mubr.msk.bf16.vlgmr.msra.gmra.mxu1 %vm1432_vm7, %v2673_v7 }
 0x9f5   :  { %3219 = vmatpush3.bf16.msra.mxu1 %v3840_v57  ;;  %3222 = vmatprep.mubr.msk.bf16.mxu1 %vm3418_vm2, %v3416_v0 }
 0x9f6   :  { %3220 = vmatprep.subr.bf16.mxu1 %v3416_v0 }
 0x9f9   :  { %3221 = vmatpush3.bf16.msra.mxu1 %v3844_v61 }
 0x9fa   :  { %3234 = vmatprep.subr.bf16.mxu1 %v3416_v0 }
 0x9fc   :  { %3223 = vmatmul.mubr.msk.bf16.vlgmr.msra.gmra.mxu1 %vm1432_vm7, %v2682_v18 }
 0x9fd   :  { %3235 = vmatpush3.bf16.msra.mxu1 %v3840_v57  ;;  %3238 = vmatprep.mubr.msk.bf16.mxu1 %vm3418_vm2, %v3416_v0 }
 0x9fe   :  { %3236 = vmatprep.subr.bf16.mxu1 %v3416_v0 }
 0xa01   :  { %3237 = vmatpush3.bf16.msra.mxu1 %v3844_v61 }
 0xa02   :  { %3250 = vmatprep.subr.bf16.mxu1 %v3416_v0 }
 0xa04   :  { %3239 = vmatmul.mubr.msk.bf16.vlgmr.msra.gmra.mxu1 %vm1432_vm7, %v2691_v19  ;;  %v3390_v19 = vld [vmem:[%s4066_s6 + $0x8] sm:$0xff]  }
 0xa05   :  { %3251 = vmatpush3.bf16.msra.mxu1 %v3840_v57  ;;  %3254 = vmatprep.mubr.msk.bf16.mxu1 %vm3418_vm2, %v3416_v0 }
 0xa06   :  { %3252 = vmatprep.subr.bf16.mxu1 %v3416_v0 }
 0xa09   :  { %3253 = vmatpush3.bf16.msra.mxu1 %v3844_v61 }
 0xa0a   :  { %3266 = vmatprep.subr.bf16.mxu1 %v3416_v0 }
 0xa0c   :  { %3255 = vmatmul.mubr.msk.bf16.vlgmr.msra.gmra.mxu1 %vm1432_vm7, %v2700_v20  ;;  %v3391_v20 = vld [vmem:[%s4066_s6] sm:$0xff]  }
 0xa0d   :  { %3267 = vmatpush3.bf16.msra.mxu1 %v3840_v57  ;;  %3270 = vmatprep.mubr.msk.bf16.mxu1 %vm3418_vm2, %v3416_v0 }
 0xa0e   :  { %3268 = vmatprep.subr.bf16.mxu1 %v3416_v0 }
 0xa11   :  { %3269 = vmatpush3.bf16.msra.mxu1 %v3844_v61 }
 0xa12   :  { %3282 = vmatprep.subr.bf16.mxu1 %v3416_v0 }
 0xa14   :  { %3271 = vmatmul.mubr.msk.bf16.vlgmr.msra.gmra.mxu1 %vm1432_vm7, %v2709_v21 }
 0xa15   :  { %3283 = vmatpush3.bf16.msra.mxu1 %v3840_v57  ;;  %3286 = vmatprep.mubr.msk.bf16.mxu1 %vm3418_vm2, %v3416_v0 }
 0xa16   :  { %3284 = vmatprep.subr.bf16.mxu1 %v3416_v0 }
 0xa19   :  { %3285 = vmatpush3.bf16.msra.mxu1 %v3844_v61 }
 0xa1a   :  { %3298 = vmatprep.subr.bf16.mxu1 %v3416_v0 }
 0xa1c   :  { %3287 = vmatmul.mubr.msk.bf16.vlgmr.msra.gmra.mxu1 %vm1432_vm7, %v2718_v23 }
 0xa1d   :  { %3299 = vmatpush3.bf16.msra.mxu1 %v3840_v57  ;;  %3302 = vmatprep.mubr.msk.bf16.mxu1 %vm3418_vm2, %v3416_v0 }
 0xa1e   :  { %3300 = vmatprep.subr.bf16.mxu1 %v3416_v0 }
 0xa21   :  { %3301 = vmatpush3.bf16.msra.mxu1 %v3844_v61  ;;  %v3386_v61 = vld [vmem:[%s4065_s5 + $0x78] sm:$0xff]  }
 0xa22   :  { %3314 = vmatprep.subr.bf16.mxu1 %v3416_v0 }
 0xa24   :  { %3303 = vmatmul.mubr.msk.bf16.vlgmr.msra.gmra.mxu1 %vm1432_vm7, %v2727_v24 }
 0xa25   :  { %3318 = vmatprep.mubr.msk.bf16.mxu1 %vm3418_vm2, %v3416_v0  ;;  %3315 = vmatpush3.bf16.msra.mxu1 %v3390_v19 }
 0xa26   :  { %3316 = vmatprep.subr.bf16.mxu1 %v3416_v0 }
 0xa29   :  { %3317 = vmatpush3.bf16.msra.mxu1 %v3391_v20 }
 0xaa4   :  { %v1640_v29 = vpop.f32.mrf.mxu0 }
 0xaa6   :  { %v3200_v30 = vpop.f32.mrf.mxu0 }
 0xaa8   :  { %v1643_v31 = vpop.f32.mrf.mxu0 }
 0xaaa   :  { %v3201_v32 = vpop.f32.mrf.mxu0 }
 0xaac   :  { %v1585_v33 = vpop.f32.mrf.mxu1 }
 0xaad   :  { %v3960_v34 = vadd.f32 %v1640_v29, %v1585_v33 }
 0xaae   :  { %v3192_v11 = vpop.f32.mrf.mxu1 }
 0xab0   :  { %v1588_v12 = vpop.f32.mrf.mxu1 }
 0xab2   :  { %v3193_v17 = vpop.f32.mrf.mxu1 }
 0xab4   :  { %v1685_v22 = vpop.f32.mrf.mxu1 }
 0xab5   :  { %v1691_v28 = vpack.c.bf16 %v1685_v22, %v1685_v22 }
 0xab6   :  { %v3208_v39 = vpop.f32.mrf.mxu1 }
 0xab7   :  { %3215 = vmatmul.mubr.msk.bf16.vlgmr.msra.gmra.mxu0 %vm1547_vm8, %v1691_v28 }
 0xab8   :  { %v1688_v35 = vpop.f32.mrf.mxu1  ;;  %3227 = vmatpush3.bf16.msra.mxu0 %v3378_v26  ;;  %3230 = vmatprep.mubr.msk.bf16.mxu0 %vm3418_vm2, %v3416_v0 }
 0xab9   :  { %3228 = vmatprep.subr.bf16.mxu0 %v3416_v0 }
 0xaba   :  { %v3209_v37 = vpop.f32.mrf.mxu1 }
 0xabc   :  { %v1792_v38 = vpop.f32.mrf.mxu1  ;;  %3229 = vmatpush3.bf16.msra.mxu0 %v3379_v36 }
 0xabd   :  { %v1798_v41 = vpack.c.bf16 %v1792_v38, %v1792_v38  ;;  %3242 = vmatprep.subr.bf16.mxu0 %v3416_v0 }
 0xabe   :  { %v3224_v42 = vpop.f32.mrf.mxu1 }
 0xabf   :  { %3231 = vmatmul.mubr.msk.bf16.vlgmr.msra.gmra.mxu0 %vm1547_vm8, %v1798_v41 }
 0xac0   :  { %v1795_v43 = vpop.f32.mrf.mxu1  ;;  %3243 = vmatpush3.bf16.msra.mxu0 %v3380_v40  ;;  %3246 = vmatprep.mubr.msk.bf16.mxu0 %vm3418_vm2, %v3416_v0 }
 0xac1   :  { %3244 = vmatprep.subr.bf16.mxu0 %v3416_v0 }
 0xac2   :  { %v3225_v45 = vpop.f32.mrf.mxu1 }
 0xac4   :  { %v1899_v46 = vpop.f32.mrf.mxu1  ;;  %3245 = vmatpush3.bf16.msra.mxu0 %v3381_v44 }
 0xac5   :  { %v1905_v48 = vpack.c.bf16 %v1899_v46, %v1899_v46  ;;  %3258 = vmatprep.subr.bf16.mxu0 %v3416_v0 }
 0xac6   :  { %v3240_v49 = vpop.f32.mrf.mxu1 }
 0xac7   :  { %3247 = vmatmul.mubr.msk.bf16.vlgmr.msra.gmra.mxu0 %vm1547_vm8, %v1905_v48  ;;  %v2736_v49 = vld [vmem:[%s4068_s8 + $0x2] ss:$0 sm:$0xff] }
 0xac8   :  { %v1902_v50 = vpop.f32.mrf.mxu1  ;;  %3259 = vmatpush3.bf16.msra.mxu0 %v3382_v47  ;;  %3262 = vmatprep.mubr.msk.bf16.mxu0 %vm3418_vm2, %v3416_v0 }
 0xac9   :  { %3260 = vmatprep.subr.bf16.mxu0 %v3416_v0 }
 0xaca   :  { %v3241_v52 = vpop.f32.mrf.mxu1 }
 0xacc   :  { %v2006_v53 = vpop.f32.mrf.mxu1  ;;  %3261 = vmatpush3.bf16.msra.mxu0 %v3383_v51 }
 0xacd   :  { %v2012_v55 = vpack.c.bf16 %v2006_v53, %v2006_v53  ;;  %3274 = vmatprep.subr.bf16.mxu0 %v3416_v0 }
 0xace   :  { %v3256_v56 = vpop.f32.mrf.mxu1 }
 0xacf   :  { %3263 = vmatmul.mubr.msk.bf16.vlgmr.msra.gmra.mxu0 %vm1547_vm8, %v2012_v55 }
 0xad0   :  { %v2009_v57 = vpop.f32.mrf.mxu1  ;;  %3275 = vmatpush3.bf16.msra.mxu0 %v3384_v54  ;;  %3278 = vmatprep.mubr.msk.bf16.mxu0 %vm3418_vm2, %v3416_v0 }
 0xad1   :  { %3276 = vmatprep.subr.bf16.mxu0 %v3416_v0  ;;  %v3392_v57 = vld [vmem:[%s4067_s7 + $0x8] sm:$0xff]  }
 0xad2   :  { %v3257_v59 = vpop.f32.mrf.mxu1 }
 0xad3   :  { %v2737_v59 = vld [vmem:[%s4068_s8 + $0x3] ss:$0 sm:$0xff] }
 0xad4   :  { %v2113_v60 = vpop.f32.mrf.mxu1  ;;  %3277 = vmatpush3.bf16.msra.mxu0 %v3385_v58  ;;  %v3393_v58 = vld [vmem:[%s4067_s7] sm:$0xff]   ;;  %s2538_s7 = sshll.u32 %s3419_s18, 4  ;;  %s2539_s7 = int_to_ptr.vmem [resolvable:$true] %s2538_s7 }
 0xad5   :  { %v2119_v62 = vpack.c.bf16 %v2113_v60, %v2113_v60  ;;  %3290 = vmatprep.subr.bf16.mxu0 %v3416_v0  ;;  %s3394_s19 = scalar_lea.vmem %s2539_s7, 32  ;;  %p3399_p1 = scmp.lt.s32.totalorder %s2539_s7, %s2539_s7 }
 0xad6   :  { %v3272_v63 = vpop.f32.mrf.mxu1  ;;  %p3395_p0 = scmp.ne.s32.totalorder %s2539_s7, %s3394_s19  ;;  %p3400_p2 = scmp.lt.s32.totalorder %s3394_s19, %s3394_s19 }
 0xad7   :  { %3279 = vmatmul.mubr.msk.bf16.vlgmr.msra.gmra.mxu0 %vm1547_vm8, %v2119_v62 }
 0xad8   :  { %v2116_v1 = vpop.f32.mrf.mxu1  ;;  %3291 = vmatpush3.bf16.msra.mxu0 %v3386_v61  ;;  %3294 = vmatprep.mubr.msk.bf16.mxu0 %vm3418_vm2, %v3416_v0  ;;  %p3401_p3 = por %p3400_p2, %p3399_p1 }
 0xad9   :  { %3292 = vmatprep.subr.bf16.mxu0 %v3416_v0 }
 0xada   :  { %v3273_v3 = vpop.f32.mrf.mxu1  ;;  %p3402_p4 = pnand %p3401_p3, %p3395_p0 }
 0xadc   :  { %v2220_v4 = vpop.f32.mrf.mxu1  ;;  %3293 = vmatpush3.bf16.msra.mxu0 %v3387_v2 }
 0xadd   :  { %v2226_v6 = vpack.c.bf16 %v2220_v4, %v2220_v4  ;;  %3306 = vmatprep.subr.bf16.mxu0 %v3416_v0 }
 0xade   :  { %v3288_v8 = vpop.f32.mrf.mxu1 }
 0xadf   :  { %3295 = vmatmul.mubr.msk.bf16.vlgmr.msra.gmra.mxu0 %vm1547_vm8, %v2226_v6 }
 0xae0   :  { %v2223_v9 = vpop.f32.mrf.mxu1  ;;  %3307 = vmatpush3.bf16.msra.mxu0 %v3388_v5  ;;  %3310 = vmatprep.mubr.msk.bf16.mxu0 %vm3418_vm2, %v3416_v0 }
 0xae1   :  { %3308 = vmatprep.subr.bf16.mxu0 %v3416_v0 }
 0xae2   :  { %v3289_v13 = vpop.f32.mrf.mxu1 }
 0xae4   :  { %v2327_v14 = vpop.f32.mrf.mxu1  ;;  %3309 = vmatpush3.bf16.msra.mxu0 %v3389_v10 }
 0xae5   :  { %v2333_v15 = vpack.c.bf16 %v2327_v14, %v2327_v14  ;;  %3322 = vmatprep.subr.bf16.mxu0 %v3416_v0 }
 0xae6   :  { %v3304_v16 = vpop.f32.mrf.mxu1 }
 0xae7   :  { %3311 = vmatmul.mubr.msk.bf16.vlgmr.msra.gmra.mxu0 %vm1547_vm8, %v2333_v15 }
 0xae8   :  { %v2330_v7 = vpop.f32.mrf.mxu1  ;;  %3326 = vmatprep.mubr.msk.bf16.mxu0 %vm3418_vm2, %v3416_v0  ;;  %3323 = vmatpush3.bf16.msra.mxu0 %v3392_v57 }
 0xae9   :  { %3324 = vmatprep.subr.bf16.mxu0 %v3416_v0  ;;  %v2741_v0 = vld [vmem:[%s4068_s8 + $0x4] ss:$0 sm:$0xff] }
 0xaea   :  { %v3305_v18 = vpop.f32.mrf.mxu1 }
 0xaec   :  { %3325 = vmatpush3.bf16.msra.mxu0 %v3393_v58 }
 0xb77   :  { %v1746_v21 = vpop.f32.mrf.mxu0 }
 0xb78   :  { %v1752_v37 = vadd.f32 %v1746_v21, %v3960_v34 }
 0xb79   :  { %v3216_v23 = vpop.f32.mrf.mxu0 }
 0xb7b   :  { %v1749_v24 = vpop.f32.mrf.mxu0 }
 0xb7d   :  { %v3217_v25 = vpop.f32.mrf.mxu0 }
 0xb7f   :  { %v1853_v27 = vpop.f32.mrf.mxu0 }
 0xb80   :  { %v1859_v40 = vadd.f32 %v1853_v27, %v1752_v37 }
 0xb81   :  { %v3232_v29 = vpop.f32.mrf.mxu0 }
 0xb83   :  { %v1856_v30 = vpop.f32.mrf.mxu0 }
 0xb85   :  { %v3233_v31 = vpop.f32.mrf.mxu0 }
 0xb87   :  { %v1960_v32 = vpop.f32.mrf.mxu0 }
 0xb88   :  { %v1966_v42 = vadd.f32 %v1960_v32, %v1859_v40 }
 0xb89   :  { %v3248_v33 = vpop.f32.mrf.mxu0 }
 0xb8b   :  { %v1963_v11 = vpop.f32.mrf.mxu0 }
 0xb8d   :  { %v3249_v12 = vpop.f32.mrf.mxu0 }
 0xb8f   :  { %v2067_v17 = vpop.f32.mrf.mxu0 }
 0xb90   :  { %v2073_v44 = vadd.f32 %v2067_v17, %v1966_v42 }
 0xb91   :  { %v3264_v22 = vpop.f32.mrf.mxu0 }
 0xb93   :  { %v2070_v26 = vpop.f32.mrf.mxu0 }
 0xb95   :  { %v3265_v28 = vpop.f32.mrf.mxu0 }
 0xb97   :  { %v2174_v39 = vpop.f32.mrf.mxu0 }
 0xb98   :  { %v2180_v46 = vadd.f32 %v2174_v39, %v2073_v44 }
 0xb99   :  { %v3280_v35 = vpop.f32.mrf.mxu0 }
 0xb9b   :  { %v2177_v36 = vpop.f32.mrf.mxu0 }
 0xb9d   :  { %v3281_v38 = vpop.f32.mrf.mxu0 }
 0xb9f   :  { %v2281_v41 = vpop.f32.mrf.mxu0 }
 0xba0   :  { %v2287_v48 = vadd.f32 %v2281_v41, %v2180_v46 }
 0xba1   :  { %v3296_v43 = vpop.f32.mrf.mxu0 }
 0xba3   :  { %v2284_v45 = vpop.f32.mrf.mxu0 }
 0xba5   :  { %v3297_v47 = vpop.f32.mrf.mxu0 }
 0xba7   :  { %v2388_v50 = vpop.f32.mrf.mxu0 }
 0xba8   :  { %v2394_v51 = vadd.f32 %v2388_v50, %v2287_v48 }
 0xba9   :  { %v3312_v52 = vpop.f32.mrf.mxu0 }
 0xbaa   :  { %v2399_v53 = vadd.f32 %v2736_v49, %v2394_v51 }
 0xbab   :  { %v2391_v54 = vpop.f32.mrf.mxu0 }
 0xbac   :  { %v2400_v34 = vmax.f32 %v2399_v53, 0.0 }
 0xbad   :  { %v3313_v55 = vpop.f32.mrf.mxu0 }
 0xbae   :  { %v2401_v56 = vpack.c.bf16 %v2400_v34, %v2400_v34 }
 0xbb0   :  { %3319 = vmatmul.mubr.msk.bf16.vlgmr.msra.gmra.mxu1 %vm1547_vm8, %v2401_v56 }
 0xc70   :  { %v2459_v60 = vpop.f32.mrf.mxu1 }
 0xc71   :  { %v2460_v61 = vadd.f32 %v2737_v59, %v2459_v60 }
 0xc72   :  { %v3320_v62 = vpop.f32.mrf.mxu1 }
 0xc73   :  { %v2465_v63 = vmax.f32 %v2460_v61, 0.0 }
 0xc74   :  { %v2462_v1 = vpop.f32.mrf.mxu1 }
 0xc75   :  { %v2466_v2 = vpack.c.bf16 %v2465_v63, %v2465_v63 }
 0xc76   :  { %v3321_v3 = vpop.f32.mrf.mxu1 }
 0xc77   :  { %3327 = vmatmul.mubr.msk.bf16.vlgmr.msra.gmra.mxu0 %vm1547_vm8, %v2466_v2 }
 0xd37   :  { %v2524_v4 = vpop.f32.mrf.mxu0 }
 0xd38   :  { %v2525_v5 = vadd.f32 %v2741_v0, %v2524_v4 }
 0xd39   :  { %v3328_v6 = vpop.f32.mrf.mxu0 }
 0xd3a   :  { %2531 = vst.msk [vmem:[#allocation2] sm:$0x3] %vm2530_vm9, %v2525_v5 }
 0xd3b   :  { %v2527_v8 = vpop.f32.mrf.mxu0 }
 0xd3c   :  { %3405 = shalt.err (!%p3402_p4)
}
 0xd3d   :  { %2541 = dma.vmem_to_hbm [thread:$0]  %s2539_s7, 32, %s4069_s9, [#allocation3]   ;;  %v3329_v9 = vpop.f32.mrf.mxu0 }
 0xd3e   :  { %3414 = dma.done.wait [#allocation3], 32  }
 0xd3f   :  { %3415 = vsyncadd [#allocation3], 4294967264 }
 0xd40   :  { %2545 = vsyncpa [#allocation3], 1 }

</bundles_post_ra>
